<compile_context>
chip_gen: v7x
topology: tpu7x:2x2x1
jax: 0.10.0
libtpu: 0.0.40
codegen_flags: <defaults>
</compile_context>

<pallas_src>
import functools

import jax
import jax.numpy as jnp
from jax.experimental import pallas as pl
from jax.experimental.pallas import tpu as pltpu

ROW_TILE_CAP = 256     # row tile for token-flattened kernels
F_TILE_CAP = 512       # hidden-dim tile for the fused FFN (halve on v7x at large F)
NCOL_TILE_CAP = 1024   # output-column tile (matters for the vocab logits linear)

# Matmul operand dtype.  jnp.float32 matches the reference numerics; set to
# jnp.bfloat16 on v6e/v7x for MXU rate + DMA/VMEM savings (accumulation stays
# f32 via preferred_element_type).
MATMUL_IN_DTYPE = jnp.float32


def _mm(a, b):
    return jnp.dot(a.astype(MATMUL_IN_DTYPE), b.astype(MATMUL_IN_DTYPE),
                   preferred_element_type=jnp.float32)


def _mm_nt(a, b):
    """a @ b.T, contracting the last dims directly (no XLU transpose)."""
    return jax.lax.dot_general(
        a.astype(MATMUL_IN_DTYPE), b.astype(MATMUL_IN_DTYPE),
        (((1,), (1,)), ((), ())),
        preferred_element_type=jnp.float32)


def _row_tile(dim, cap=ROW_TILE_CAP):
    """Sublane-aligned (x8) row tile dividing `dim`; prefers >=2 grid steps so
    both v7x TensorCores get work; falls back to the full dim."""
    if dim % 8 != 0:
        return dim
    cand = [t for t in range(8, min(dim, cap) + 1, 8) if dim % t == 0]
    if not cand:
        return dim
    two = [t for t in cand if dim // t >= 2]
    return max(two) if two else max(cand)


def _col_tile(dim, cap=NCOL_TILE_CAP):
    """Lane-aligned (x128) column tile dividing `dim`, or the full dim (keeps
    output stores unmasked / lane-dense)."""
    if dim <= cap or dim % 128 != 0:
        return dim
    cand = [t for t in range(128, cap + 1, 128) if dim % t == 0]
    return max(cand) if cand else dim


def _layernorm(z, g, b):
    mean = jnp.mean(z, axis=-1, keepdims=True)
    var = jnp.mean(jnp.square(z - mean), axis=-1, keepdims=True)  # biased, as torch
    return (z - mean) * jax.lax.rsqrt(var + 1e-5) * g + b


# ----------------------------- Pallas kernels ------------------------------ #

def _attn_block_kernel(*refs, scale, causal, heads, head_dim, has_mask):
    """Fused per-batch: Q/KV projection + MHA + Wo + residual + LayerNorm."""
    if has_mask:
        (km_ref, kv_in_ref, q_in_ref, wq_ref, wkv_ref, wo_ref, bo_ref,
         g_ref, b_ref, o_ref) = refs
    else:
        (kv_in_ref, q_in_ref, wq_ref, wkv_ref, wo_ref, bo_ref,
         g_ref, b_ref, o_ref) = refs

    x_q = q_in_ref[0]                        # (Lq, E)  query input (= residual)
    x_kv = kv_in_ref[0]                      # (Lk, E)
    Lq, E = x_q.shape
    Lk = x_kv.shape[0]
    D = head_dim

    # Fused lane-dense projections (block-diagonal per-head weights baked in).
    q = _mm(x_q, wq_ref[...])                # (Lq, E)
    kv = _mm(x_kv, wkv_ref[...])             # (Lk, 2E)  K | V

    # Mask built once, outside the head loop.
    neg = jnp.float32(-1e20)
    mask_bool = None
    if has_mask:
        mask_bool = jnp.broadcast_to(km_ref[0], (Lq, Lk)) > 0.0
    if causal:
        qi = jax.lax.broadcasted_iota(jnp.int32, (Lq, Lk), 0)
        ki = jax.lax.broadcasted_iota(jnp.int32, (Lq, Lk), 1)
        tri = qi >= ki
        mask_bool = tri if mask_bool is None else jnp.logical_and(mask_bool, tri)

    # TODO(synk): at realistic L/H, move heads onto a grid axis / fori_loop to
    #             bound live ranges instead of this static unroll.
    head_outs = []
    for h in range(heads):
        qh = q[:, h * D:(h + 1) * D]                 # (Lq, D)
        kh = kv[:, h * D:(h + 1) * D]                # (Lk, D)
        vh = kv[:, E + h * D:E + (h + 1) * D]        # (Lk, D)
        e = _mm_nt(qh, kh)                           # (Lq, Lk), no K transpose
        if mask_bool is not None:
            e = jnp.where(mask_bool, e, neg)         # masked_fill(mask == 0, -1e20)
        e = e * scale                                # / sqrt(embed_size), as reference
        e = e - jnp.max(e, axis=-1, keepdims=True)
        p = jnp.exp(e)
        p = p * pl.reciprocal(jnp.sum(p, axis=-1, keepdims=True), approx=True)
        head_outs.append(_mm(p, vh))

    attn = jnp.concatenate(head_outs, axis=-1)       # lane-dense (Lq, E), one store
    o = _mm(attn, wo_ref[...]) + bo_ref[...]

    # residual + LayerNorm fused — no HBM round trip of the attention output.
    o_ref[0] = _layernorm(o + x_q, g_ref[...], b_ref[...])


def _ffn_ln_kernel(x_ref, w1t_ref, b1_ref, w2t_ref, b2_ref, g_ref, bln_ref, o_ref):
    """Fused Linear -> ReLU -> Linear (tiled over F, accumulating directly into
    the resident output block) + residual + LayerNorm epilogue."""
    f = pl.program_id(1)

    @pl.when(f == 0)
    def _():
        o_ref[...] = jnp.zeros_like(o_ref)

    h = jnp.maximum(_mm(x_ref[...], w1t_ref[...]) + b1_ref[...], 0.0)
    o_ref[...] += _mm(h, w2t_ref[...])

    @pl.when(f == pl.num_programs(1) - 1)
    def _():
        z = o_ref[...] + b2_ref[...] + x_ref[...]    # 2nd-layer bias + residual
        o_ref[...] = _layernorm(z, g_ref[...], bln_ref[...])


def _linear_bias_kernel(x_ref, wt_ref, b_ref, o_ref):
    o_ref[...] = _mm(x_ref[...], wt_ref[...]) + b_ref[...]


# ------------------------------ Pallas wrappers ----------------------------- #

def attention_block(p, kv_in, query_in, key_mask, causal, embed_size, heads,
                    ln_g, ln_b):
    """LayerNorm(SelfAttention(kv_in, kv_in, query_in, mask) + query_in)."""
    N, Lq, E = query_in.shape
    Lk = kv_in.shape[1]
    has_mask = key_mask is not None
    scale = 1.0 / (float(embed_size) ** 0.5)          # sqrt(embed_size), as reference
    kern = functools.partial(_attn_block_kernel, scale=scale, causal=causal,
                             heads=heads, head_dim=E // heads, has_mask=has_mask)
    in_specs = []
    args = []
    if has_mask:
        in_specs.append(pl.BlockSpec((1, 1, Lk), lambda b: (b, 0, 0)))
        args.append(key_mask)
    in_specs += [
        pl.BlockSpec((1, Lk, E), lambda b: (b, 0, 0)),
        pl.BlockSpec((1, Lq, E), lambda b: (b, 0, 0)),
        pl.BlockSpec((E, E), lambda b: (0, 0)),
        pl.BlockSpec((E, 2 * E), lambda b: (0, 0)),
        pl.BlockSpec((E, E), lambda b: (0, 0)),
        pl.BlockSpec((1, E), lambda b: (0, 0)),
        pl.BlockSpec((1, E), lambda b: (0, 0)),
        pl.BlockSpec((1, E), lambda b: (0, 0)),
    ]
    args += [kv_in, query_in, p["Wq_t"], p["Wkv_t"], p["Wo_t"], p["bo"],
             ln_g, ln_b]
    return pl.pallas_call(
        kern,
        out_shape=jax.ShapeDtypeStruct((N, Lq, E), jnp.float32),
        grid=(N,),
        in_specs=in_specs,
        out_specs=pl.BlockSpec((1, Lq, E), lambda b: (b, 0, 0)),
        compiler_params=pltpu.CompilerParams(dimension_semantics=("parallel",)),
    )(*args)


def ffn_ln(x, w1t, b1, w2t, b2, ln_g, ln_b):
    """LayerNorm(Linear(ReLU(Linear(x))) + x).  x: (M, E)."""
    M, E = x.shape
    F = w1t.shape[1]
    bm = _row_tile(M)
    bf = _col_tile(F, F_TILE_CAP)
    return pl.pallas_call(
        _ffn_ln_kernel,
        out_shape=jax.ShapeDtypeStruct((M, E), jnp.float32),
        grid=(M // bm, F // bf),
        in_specs=[
            pl.BlockSpec((bm, E), lambda i, f: (i, 0)),
            pl.BlockSpec((E, bf), lambda i, f: (0, f)),
            pl.BlockSpec((1, bf), lambda i, f: (0, f)),
            pl.BlockSpec((bf, E), lambda i, f: (f, 0)),
            pl.BlockSpec((1, E), lambda i, f: (0, 0)),
            pl.BlockSpec((1, E), lambda i, f: (0, 0)),
            pl.BlockSpec((1, E), lambda i, f: (0, 0)),
        ],
        out_specs=pl.BlockSpec((bm, E), lambda i, f: (i, 0)),
        compiler_params=pltpu.CompilerParams(
            dimension_semantics=("parallel", "arbitrary")),
    )(x, w1t, b1, w2t, b2, ln_g, ln_b)


def linear(x, wt, b):
    """x: (M, K); wt: (K, Nout) pre-transposed weight; b: (1, Nout)."""
    M, K = x.shape
    Nout = wt.shape[1]
    bm = _row_tile(M)
    bn = _col_tile(Nout)
    # TODO(synk): add a K grid axis with accumulation for very large K (v5e VMEM).
    return pl.pallas_call(
        _linear_bias_kernel,
        out_shape=jax.ShapeDtypeStruct((M, Nout), jnp.float32),
        grid=(M // bm, Nout // bn),
        in_specs=[
            pl.BlockSpec((bm, K), lambda i, j: (i, 0)),
            pl.BlockSpec((K, bn), lambda i, j: (0, j)),
            pl.BlockSpec((1, bn), lambda i, j: (0, j)),
        ],
        out_specs=pl.BlockSpec((bm, bn), lambda i, j: (i, j)),
        compiler_params=pltpu.CompilerParams(
            dimension_semantics=("parallel", "parallel")),
    )(x, wt, b)


# --------------------------- Model (JAX glue) ------------------------------ #

def transformer_block(p, kv, query, key_mask, embed_size, heads):
    N, Lq, E = query.shape
    x = attention_block(p["attn"], kv, query, key_mask, False, embed_size, heads,
                        p["ln1_g"], p["ln1_b"])                 # LN(attn + query)
    out = ffn_ln(x.reshape(-1, E), p["W1_t"], p["b1"], p["W2_t"], p["b2"],
                 p["ln2_g"], p["ln2_b"])                        # LN(FFN(x) + x)
    return out.reshape(N, Lq, E)


def encoder_forward(p, src, src_key_mask, embed_size, heads):
    N, L = src.shape
    # TODO(synk): embedding gather kept in JAX (no profitable Pallas win here).
    x = p["word_emb"][src] + p["pos_emb"][:L][None, :, :]
    for layer in p["layers"]:
        x = transformer_block(layer, x, x, src_key_mask, embed_size, heads)
    return x


def decoder_forward(p, tag, enc_out, src_key_mask, embed_size, heads):
    N, L = tag.shape
    E = embed_size
    x = p["word_emb"][tag] + p["pos_emb"][:L][None, :, :]
    for layer in p["layers"]:
        # Decoder self-attention: causal-only mask (in-kernel iota, no key mask).
        query = attention_block(layer["attn"], x, x, None, True, E, heads,
                                layer["ln_g"], layer["ln_b"])
        x = transformer_block(layer["tb"], enc_out, query, src_key_mask, E, heads)
    logits = linear(x.reshape(-1, E), p["fc_W_t"], p["fc_b"])
    return logits.reshape(N, L, -1)


def transformer_forward(params, src, tag, src_pad_idx, embed_size, heads):
    # Key-padding vector (N, 1, Ls) replaces the materialized (N,1,Lq,Lk) mask.
    src_key_mask = (src != src_pad_idx).astype(jnp.float32)[:, None, :]
    enc = encoder_forward(params["enc"], src, src_key_mask, embed_size, heads)
    return decoder_forward(params["dec"], tag, enc, src_key_mask, embed_size, heads)


# ----------------------------- Parameter init ------------------------------ #

def init_params(key, src_vocab, tag_vocab, embed_size, heads, num_layers,
                forward_expansion, max_length):
    E = embed_size
    D = E // heads
    F = forward_expansion * E
    keys = iter(jax.random.split(key, 4096))

    def nrm(shape, s=0.05):
        return jax.random.normal(next(keys), shape, jnp.float32) * s

    eye_h = jnp.eye(heads, dtype=jnp.float32)

    def attn_params():
        # Per-head torch-layout weights (D, D), fused once into block-diagonal,
        # pre-transposed (K, N) matrices for the lane-dense kernels.
        Wq, Wk, Wv = nrm((D, D)), nrm((D, D)), nrm((D, D))
        Wo = nrm((E, E))
        return dict(
            Wq_t=jnp.kron(eye_h, Wq.T),                                     # (E, E)
            Wkv_t=jnp.concatenate([jnp.kron(eye_h, Wk.T),
                                   jnp.kron(eye_h, Wv.T)], axis=1),         # (E, 2E)
            Wo_t=Wo.T,                                                      # (E, E)
            bo=jnp.zeros((1, E), jnp.float32))

    def tb_params():
        W1, W2 = nrm((F, E)), nrm((E, F))
        return dict(attn=attn_params(),
                    ln1_g=jnp.ones((1, E), jnp.float32),
                    ln1_b=jnp.zeros((1, E), jnp.float32),
                    ln2_g=jnp.ones((1, E), jnp.float32),
                    ln2_b=jnp.zeros((1, E), jnp.float32),
                    W1_t=W1.T, b1=jnp.zeros((1, F), jnp.float32),
                    W2_t=W2.T, b2=jnp.zeros((1, E), jnp.float32))

    enc = dict(word_emb=nrm((src_vocab, E), 1.0),
               pos_emb=nrm((max_length, E), 1.0),
               layers=[tb_params() for _ in range(num_layers)])
    fcW = nrm((tag_vocab, E))
    dec = dict(word_emb=nrm((tag_vocab, E), 1.0),
               pos_emb=nrm((max_length, E), 1.0),
               layers=[dict(attn=attn_params(),
                            ln_g=jnp.ones((1, E), jnp.float32),
                            ln_b=jnp.zeros((1, E), jnp.float32),
                            tb=tb_params())
                       for _ in range(num_layers)],
               fc_W_t=fcW.T, fc_b=jnp.zeros((1, tag_vocab), jnp.float32))
    return dict(enc=enc, dec=dec)


# ---------------------------------- Main ----------------------------------- #

if __name__ == "__main__":
    SRC_VOCAB, TAG_VOCAB = 50, 40
    SRC_PAD = 0
    EMBED, HEADS, LAYERS, FEXP, MAXLEN = 32, 4, 2, 4, 100
    N, LS, LT = 2, 8, 8

    root = jax.random.PRNGKey(0)
    kp, ks, kt = jax.random.split(root, 3)
    params = init_params(kp, SRC_VOCAB, TAG_VOCAB, EMBED, HEADS, LAYERS,
                         FEXP, MAXLEN)

    src = jax.random.randint(ks, (N, LS), 1, SRC_VOCAB, dtype=jnp.int32)
    tag = jax.random.randint(kt, (N, LT), 1, TAG_VOCAB, dtype=jnp.int32)
    src = src.at[0, LS - 1].set(SRC_PAD)   # exercise the src padding mask

    fwd = jax.jit(lambda p, s, t: transformer_forward(p, s, t, SRC_PAD, EMBED, HEADS))
    out = fwd(params, src, tag)
    jax.block_until_ready(out)

    assert out.shape == (N, LT, TAG_VOCAB), out.shape
    assert bool(jnp.all(jnp.isfinite(out)))
    print("KERNEL_OK")
</pallas_src>

<mosaic_0001>
module attributes {stable_mosaic.version = 11 : i64} {
  func.func @_attn_block_kernel(%arg0: i32, %arg1: memref<1x1x8xf32, #tpu.memory_space<vmem>>, %arg2: memref<1x8x32xf32, #tpu.memory_space<vmem>>, %arg3: memref<1x8x32xf32, #tpu.memory_space<vmem>>, %arg4: memref<32x32xf32, #tpu.memory_space<vmem>>, %arg5: memref<32x64xf32, #tpu.memory_space<vmem>>, %arg6: memref<32x32xf32, #tpu.memory_space<vmem>>, %arg7: memref<1x32xf32, #tpu.memory_space<vmem>>, %arg8: memref<1x32xf32, #tpu.memory_space<vmem>>, %arg9: memref<1x32xf32, #tpu.memory_space<vmem>>, %arg10: memref<1x8x32xf32, #tpu.memory_space<vmem>>) attributes {dimension_semantics = [#tpu.dimension_semantics<parallel>], iteration_bounds = array<i64: 2>, scalar_prefetch = 0 : i64, scratch_operands = 0 : i64, tpu.core_type = #tpu.core_type<tc>, window_params = [{transform_indices = @transform_0, window_bounds = array<i64: 1, 1, 8>}, {transform_indices = @transform_1, window_bounds = array<i64: 1, 8, 32>}, {transform_indices = @transform_2, window_bounds = array<i64: 1, 8, 32>}, {pipeline_mode = #tpu.pipeline_mode<synchronous>, transform_indices = @transform_3, window_bounds = array<i64: 32, 32>}, {pipeline_mode = #tpu.pipeline_mode<synchronous>, transform_indices = @transform_4, window_bounds = array<i64: 32, 64>}, {pipeline_mode = #tpu.pipeline_mode<synchronous>, transform_indices = @transform_5, window_bounds = array<i64: 32, 32>}, {pipeline_mode = #tpu.pipeline_mode<synchronous>, transform_indices = @transform_6, window_bounds = array<i64: 1, 32>}, {pipeline_mode = #tpu.pipeline_mode<synchronous>, transform_indices = @transform_7, window_bounds = array<i64: 1, 32>}, {pipeline_mode = #tpu.pipeline_mode<synchronous>, transform_indices = @transform_8, window_bounds = array<i64: 1, 32>}, {transform_indices = @transform_9, window_bounds = array<i64: 1, 8, 32>}]} {
    %c0 = arith.constant 0 : index
    %c0_0 = arith.constant 0 : index
    %c0_1 = arith.constant 0 : index
    %0 = vector.load %arg3[%c0, %c0_0, %c0_1] : memref<1x8x32xf32, #tpu.memory_space<vmem>>, vector<1x8x32xf32>
    %1 = vector.shape_cast %0 : vector<1x8x32xf32> to vector<8x32xf32>
    %c0_2 = arith.constant 0 : index
    %c0_3 = arith.constant 0 : index
    %c0_4 = arith.constant 0 : index
    %2 = vector.load %arg2[%c0_2, %c0_3, %c0_4] : memref<1x8x32xf32, #tpu.memory_space<vmem>>, vector<1x8x32xf32>
    %3 = vector.shape_cast %2 : vector<1x8x32xf32> to vector<8x32xf32>
    %c0_5 = arith.constant 0 : index
    %c0_6 = arith.constant 0 : index
    %4 = vector.load %arg4[%c0_5, %c0_6] : memref<32x32xf32, #tpu.memory_space<vmem>>, vector<32x32xf32>
    %cst = arith.constant dense<0.000000e+00> : vector<8x32xf32>
    %5 = tpu.matmul %1, %4, %cst {dimension_numbers = #tpu.dot_dimension_numbers<[1], [0], [0], [1], [0, 0, 1, 1], [], []>} : vector<8x32xf32>, vector<32x32xf32>, vector<8x32xf32> -> vector<8x32xf32>
    %c0_7 = arith.constant 0 : index
    %c0_8 = arith.constant 0 : index
    %6 = vector.load %arg5[%c0_7, %c0_8] : memref<32x64xf32, #tpu.memory_space<vmem>>, vector<32x64xf32>
    %cst_9 = arith.constant dense<0.000000e+00> : vector<8x64xf32>
    %7 = tpu.matmul %3, %6, %cst_9 {dimension_numbers = #tpu.dot_dimension_numbers<[1], [0], [0], [1], [0, 0, 1, 1], [], []>} : vector<8x32xf32>, vector<32x64xf32>, vector<8x64xf32> -> vector<8x64xf32>
    %c0_10 = arith.constant 0 : index
    %c0_11 = arith.constant 0 : index
    %c0_12 = arith.constant 0 : index
    %8 = vector.load %arg1[%c0_10, %c0_11, %c0_12] : memref<1x1x8xf32, #tpu.memory_space<vmem>>, vector<1x1x8xf32>
    %9 = vector.shape_cast %8 : vector<1x1x8xf32> to vector<1x8xf32>
    %10 = vector.shape_cast %9 : vector<1x8xf32> to vector<1x8xf32>
    %11 = vector.broadcast %10 : vector<1x8xf32> to vector<8x8xf32>
    %cst_13 = arith.constant 0.000000e+00 : f32
    %12 = vector.broadcast %cst_13 : f32 to vector<8x8xf32>
    %13 = arith.cmpf ogt, %11, %12 : vector<8x8xf32>
    %14 = vector.extract_strided_slice %5 {offsets = [0, 0], sizes = [8, 8], strides = [1, 1]} : vector<8x32xf32> to vector<8x8xf32>
    %15 = vector.extract_strided_slice %7 {offsets = [0, 0], sizes = [8, 8], strides = [1, 1]} : vector<8x64xf32> to vector<8x8xf32>
    %16 = vector.extract_strided_slice %7 {offsets = [0, 32], sizes = [8, 8], strides = [1, 1]} : vector<8x64xf32> to vector<8x8xf32>
    %cst_14 = arith.constant dense<0.000000e+00> : vector<8x8xf32>
    %17 = tpu.matmul %14, %15, %cst_14 {dimension_numbers = #tpu.dot_dimension_numbers<[1], [1], [0], [0], [0, 0, 1, 0], [], []>} : vector<8x8xf32>, vector<8x8xf32>, vector<8x8xf32> -> vector<8x8xf32>
    %cst_15 = arith.constant -1.000000e+20 : f32
    %18 = vector.broadcast %cst_15 : f32 to vector<8x8xf32>
    %19 = arith.select %13, %17, %18 : vector<8x8xi1>, vector<8x8xf32>
    %cst_16 = arith.constant 0.176776692 : f32
    %20 = vector.broadcast %cst_16 : f32 to vector<8x8xf32>
    %21 = arith.mulf %19, %20 : vector<8x8xf32>
    %cst_17 = arith.constant dense<0xFF800000> : vector<8xf32>
    %22 = vector.multi_reduction <maximumf>, %21, %cst_17 [1] : vector<8x8xf32> to vector<8xf32>
    %23 = vector.shape_cast %22 : vector<8xf32> to vector<8x1xf32>
    %24 = vector.broadcast %23 : vector<8x1xf32> to vector<8x8xf32>
    %25 = arith.subf %21, %24 : vector<8x8xf32>
    %26 = math.exp %25 : vector<8x8xf32>
    %cst_18 = arith.constant dense<0.000000e+00> : vector<8xf32>
    %27 = vector.multi_reduction <add>, %26, %cst_18 [1] : vector<8x8xf32> to vector<8xf32>
    %28 = vector.shape_cast %27 : vector<8xf32> to vector<8x1xf32>
    %29 = tpu.reciprocal %28 {approx = true} : vector<8x1xf32> -> vector<8x1xf32>
    %30 = vector.broadcast %29 : vector<8x1xf32> to vector<8x8xf32>
    %31 = arith.mulf %26, %30 : vector<8x8xf32>
    %cst_19 = arith.constant dense<0.000000e+00> : vector<8x8xf32>
    %32 = tpu.matmul %31, %16, %cst_19 {dimension_numbers = #tpu.dot_dimension_numbers<[1], [0], [0], [1], [0, 0, 1, 1], [], []>} : vector<8x8xf32>, vector<8x8xf32>, vector<8x8xf32> -> vector<8x8xf32>
    %33 = vector.extract_strided_slice %5 {offsets = [0, 8], sizes = [8, 8], strides = [1, 1]} : vector<8x32xf32> to vector<8x8xf32>
    %34 = vector.extract_strided_slice %7 {offsets = [0, 8], sizes = [8, 8], strides = [1, 1]} : vector<8x64xf32> to vector<8x8xf32>
    %35 = vector.extract_strided_slice %7 {offsets = [0, 40], sizes = [8, 8], strides = [1, 1]} : vector<8x64xf32> to vector<8x8xf32>
    %cst_20 = arith.constant dense<0.000000e+00> : vector<8x8xf32>
    %36 = tpu.matmul %33, %34, %cst_20 {dimension_numbers = #tpu.dot_dimension_numbers<[1], [1], [0], [0], [0, 0, 1, 0], [], []>} : vector<8x8xf32>, vector<8x8xf32>, vector<8x8xf32> -> vector<8x8xf32>
    %cst_21 = arith.constant -1.000000e+20 : f32
    %37 = vector.broadcast %cst_21 : f32 to vector<8x8xf32>
    %38 = arith.select %13, %36, %37 : vector<8x8xi1>, vector<8x8xf32>
    %cst_22 = arith.constant 0.176776692 : f32
    %39 = vector.broadcast %cst_22 : f32 to vector<8x8xf32>
    %40 = arith.mulf %38, %39 : vector<8x8xf32>
    %cst_23 = arith.constant dense<0xFF800000> : vector<8xf32>
    %41 = vector.multi_reduction <maximumf>, %40, %cst_23 [1] : vector<8x8xf32> to vector<8xf32>
    %42 = vector.shape_cast %41 : vector<8xf32> to vector<8x1xf32>
    %43 = vector.broadcast %42 : vector<8x1xf32> to vector<8x8xf32>
    %44 = arith.subf %40, %43 : vector<8x8xf32>
    %45 = math.exp %44 : vector<8x8xf32>
    %cst_24 = arith.constant dense<0.000000e+00> : vector<8xf32>
    %46 = vector.multi_reduction <add>, %45, %cst_24 [1] : vector<8x8xf32> to vector<8xf32>
    %47 = vector.shape_cast %46 : vector<8xf32> to vector<8x1xf32>
    %48 = tpu.reciprocal %47 {approx = true} : vector<8x1xf32> -> vector<8x1xf32>
    %49 = vector.broadcast %48 : vector<8x1xf32> to vector<8x8xf32>
    %50 = arith.mulf %45, %49 : vector<8x8xf32>
    %cst_25 = arith.constant dense<0.000000e+00> : vector<8x8xf32>
    %51 = tpu.matmul %50, %35, %cst_25 {dimension_numbers = #tpu.dot_dimension_numbers<[1], [0], [0], [1], [0, 0, 1, 1], [], []>} : vector<8x8xf32>, vector<8x8xf32>, vector<8x8xf32> -> vector<8x8xf32>
    %52 = vector.extract_strided_slice %5 {offsets = [0, 16], sizes = [8, 8], strides = [1, 1]} : vector<8x32xf32> to vector<8x8xf32>
    %53 = vector.extract_strided_slice %7 {offsets = [0, 16], sizes = [8, 8], strides = [1, 1]} : vector<8x64xf32> to vector<8x8xf32>
    %54 = vector.extract_strided_slice %7 {offsets = [0, 48], sizes = [8, 8], strides = [1, 1]} : vector<8x64xf32> to vector<8x8xf32>
    %cst_26 = arith.constant dense<0.000000e+00> : vector<8x8xf32>
    %55 = tpu.matmul %52, %53, %cst_26 {dimension_numbers = #tpu.dot_dimension_numbers<[1], [1], [0], [0], [0, 0, 1, 0], [], []>} : vector<8x8xf32>, vector<8x8xf32>, vector<8x8xf32> -> vector<8x8xf32>
    %cst_27 = arith.constant -1.000000e+20 : f32
    %56 = vector.broadcast %cst_27 : f32 to vector<8x8xf32>
    %57 = arith.select %13, %55, %56 : vector<8x8xi1>, vector<8x8xf32>
    %cst_28 = arith.constant 0.176776692 : f32
    %58 = vector.broadcast %cst_28 : f32 to vector<8x8xf32>
    %59 = arith.mulf %57, %58 : vector<8x8xf32>
    %cst_29 = arith.constant dense<0xFF800000> : vector<8xf32>
    %60 = vector.multi_reduction <maximumf>, %59, %cst_29 [1] : vector<8x8xf32> to vector<8xf32>
    %61 = vector.shape_cast %60 : vector<8xf32> to vector<8x1xf32>
    %62 = vector.broadcast %61 : vector<8x1xf32> to vector<8x8xf32>
    %63 = arith.subf %59, %62 : vector<8x8xf32>
    %64 = math.exp %63 : vector<8x8xf32>
    %cst_30 = arith.constant dense<0.000000e+00> : vector<8xf32>
    %65 = vector.multi_reduction <add>, %64, %cst_30 [1] : vector<8x8xf32> to vector<8xf32>
    %66 = vector.shape_cast %65 : vector<8xf32> to vector<8x1xf32>
    %67 = tpu.reciprocal %66 {approx = true} : vector<8x1xf32> -> vector<8x1xf32>
    %68 = vector.broadcast %67 : vector<8x1xf32> to vector<8x8xf32>
    %69 = arith.mulf %64, %68 : vector<8x8xf32>
    %cst_31 = arith.constant dense<0.000000e+00> : vector<8x8xf32>
    %70 = tpu.matmul %69, %54, %cst_31 {dimension_numbers = #tpu.dot_dimension_numbers<[1], [0], [0], [1], [0, 0, 1, 1], [], []>} : vector<8x8xf32>, vector<8x8xf32>, vector<8x8xf32> -> vector<8x8xf32>
    %71 = vector.extract_strided_slice %5 {offsets = [0, 24], sizes = [8, 8], strides = [1, 1]} : vector<8x32xf32> to vector<8x8xf32>
    %72 = vector.extract_strided_slice %7 {offsets = [0, 24], sizes = [8, 8], strides = [1, 1]} : vector<8x64xf32> to vector<8x8xf32>
    %73 = vector.extract_strided_slice %7 {offsets = [0, 56], sizes = [8, 8], strides = [1, 1]} : vector<8x64xf32> to vector<8x8xf32>
    %cst_32 = arith.constant dense<0.000000e+00> : vector<8x8xf32>
    %74 = tpu.matmul %71, %72, %cst_32 {dimension_numbers = #tpu.dot_dimension_numbers<[1], [1], [0], [0], [0, 0, 1, 0], [], []>} : vector<8x8xf32>, vector<8x8xf32>, vector<8x8xf32> -> vector<8x8xf32>
    %cst_33 = arith.constant -1.000000e+20 : f32
    %75 = vector.broadcast %cst_33 : f32 to vector<8x8xf32>
    %76 = arith.select %13, %74, %75 : vector<8x8xi1>, vector<8x8xf32>
    %cst_34 = arith.constant 0.176776692 : f32
    %77 = vector.broadcast %cst_34 : f32 to vector<8x8xf32>
    %78 = arith.mulf %76, %77 : vector<8x8xf32>
    %cst_35 = arith.constant dense<0xFF800000> : vector<8xf32>
    %79 = vector.multi_reduction <maximumf>, %78, %cst_35 [1] : vector<8x8xf32> to vector<8xf32>
    %80 = vector.shape_cast %79 : vector<8xf32> to vector<8x1xf32>
    %81 = vector.broadcast %80 : vector<8x1xf32> to vector<8x8xf32>
    %82 = arith.subf %78, %81 : vector<8x8xf32>
    %83 = math.exp %82 : vector<8x8xf32>
    %cst_36 = arith.constant dense<0.000000e+00> : vector<8xf32>
    %84 = vector.multi_reduction <add>, %83, %cst_36 [1] : vector<8x8xf32> to vector<8xf32>
    %85 = vector.shape_cast %84 : vector<8xf32> to vector<8x1xf32>
    %86 = tpu.reciprocal %85 {approx = true} : vector<8x1xf32> -> vector<8x1xf32>
    %87 = vector.broadcast %86 : vector<8x1xf32> to vector<8x8xf32>
    %88 = arith.mulf %83, %87 : vector<8x8xf32>
    %cst_37 = arith.constant dense<0.000000e+00> : vector<8x8xf32>
    %89 = tpu.matmul %88, %73, %cst_37 {dimension_numbers = #tpu.dot_dimension_numbers<[1], [0], [0], [1], [0, 0, 1, 1], [], []>} : vector<8x8xf32>, vector<8x8xf32>, vector<8x8xf32> -> vector<8x8xf32>
    %90 = tpu.concatenate %32, %51, %70, %89 in 1 : vector<8x8xf32>, vector<8x8xf32>, vector<8x8xf32>, vector<8x8xf32> -> vector<8x32xf32>
    %c0_38 = arith.constant 0 : index
    %c0_39 = arith.constant 0 : index
    %91 = vector.load %arg6[%c0_38, %c0_39] : memref<32x32xf32, #tpu.memory_space<vmem>>, vector<32x32xf32>
    %cst_40 = arith.constant dense<0.000000e+00> : vector<8x32xf32>
    %92 = tpu.matmul %90, %91, %cst_40 {dimension_numbers = #tpu.dot_dimension_numbers<[1], [0], [0], [1], [0, 0, 1, 1], [], []>} : vector<8x32xf32>, vector<32x32xf32>, vector<8x32xf32> -> vector<8x32xf32>
    %c0_41 = arith.constant 0 : index
    %c0_42 = arith.constant 0 : index
    %93 = vector.load %arg7[%c0_41, %c0_42] : memref<1x32xf32, #tpu.memory_space<vmem>>, vector<1x32xf32>
    %94 = vector.broadcast %93 : vector<1x32xf32> to vector<8x32xf32>
    %95 = arith.addf %92, %94 : vector<8x32xf32>
    %96 = arith.addf %95, %1 : vector<8x32xf32>
    %c0_43 = arith.constant 0 : index
    %c0_44 = arith.constant 0 : index
    %97 = vector.load %arg8[%c0_43, %c0_44] : memref<1x32xf32, #tpu.memory_space<vmem>>, vector<1x32xf32>
    %c0_45 = arith.constant 0 : index
    %c0_46 = arith.constant 0 : index
    %98 = vector.load %arg9[%c0_45, %c0_46] : memref<1x32xf32, #tpu.memory_space<vmem>>, vector<1x32xf32>
    %cst_47 = arith.constant dense<0.000000e+00> : vector<8xf32>
    %99 = vector.multi_reduction <add>, %96, %cst_47 [1] : vector<8x32xf32> to vector<8xf32>
    %100 = vector.shape_cast %99 : vector<8xf32> to vector<8x1xf32>
    %cst_48 = arith.constant 3.200000e+01 : f32
    %101 = vector.broadcast %cst_48 : f32 to vector<8x1xf32>
    %102 = arith.divf %100, %101 : vector<8x1xf32>
    %103 = vector.broadcast %102 : vector<8x1xf32> to vector<8x32xf32>
    %104 = arith.subf %96, %103 : vector<8x32xf32>
    %105 = arith.mulf %104, %104 : vector<8x32xf32>
    %cst_49 = arith.constant dense<0.000000e+00> : vector<8xf32>
    %106 = vector.multi_reduction <add>, %105, %cst_49 [1] : vector<8x32xf32> to vector<8xf32>
    %107 = vector.shape_cast %106 : vector<8xf32> to vector<8x1xf32>
    %cst_50 = arith.constant 3.200000e+01 : f32
    %108 = vector.broadcast %cst_50 : f32 to vector<8x1xf32>
    %109 = arith.divf %107, %108 : vector<8x1xf32>
    %110 = vector.broadcast %102 : vector<8x1xf32> to vector<8x32xf32>
    %111 = arith.subf %96, %110 : vector<8x32xf32>
    %cst_51 = arith.constant 9.99999974E-6 : f32
    %112 = vector.broadcast %cst_51 : f32 to vector<8x1xf32>
    %113 = arith.addf %109, %112 : vector<8x1xf32>
    %114 = math.rsqrt %113 : vector<8x1xf32>
    %115 = vector.broadcast %114 : vector<8x1xf32> to vector<8x32xf32>
    %116 = arith.mulf %111, %115 : vector<8x32xf32>
    %117 = vector.broadcast %97 : vector<1x32xf32> to vector<8x32xf32>
    %118 = arith.mulf %116, %117 : vector<8x32xf32>
    %119 = vector.broadcast %98 : vector<1x32xf32> to vector<8x32xf32>
    %120 = arith.addf %118, %119 : vector<8x32xf32>
    %c0_52 = arith.constant 0 : index
    %c0_53 = arith.constant 0 : index
    %c0_54 = arith.constant 0 : index
    %121 = vector.load %arg10[%c0_52, %c0_53, %c0_54] : memref<1x8x32xf32, #tpu.memory_space<vmem>>, vector<1x8x32xf32>
    %122 = vector.shape_cast %121 : vector<1x8x32xf32> to vector<8x32xf32>
    %123 = vector.shape_cast %120 : vector<8x32xf32> to vector<1x8x32xf32>
    tpu.vector_store %arg10[%c0_52, %c0_53, %c0_54], %123 {strides = array<i32>} : memref<1x8x32xf32, #tpu.memory_space<vmem>>, vector<1x8x32xf32>,
    return
  }
  func.func @transform_0(%arg0: i32) -> (i32, i32, i32) {
    %c0_i32 = arith.constant 0 : i32
    %c0_i32_0 = arith.constant 0 : i32
    %c0_i32_1 = arith.constant 0 : i32
    return %arg0, %c0_i32, %c0_i32_0 : i32, i32, i32
  }
  func.func @transform_1(%arg0: i32) -> (i32, i32, i32) {
    %c0_i32 = arith.constant 0 : i32
    %c0_i32_0 = arith.constant 0 : i32
    %c0_i32_1 = arith.constant 0 : i32
    return %arg0, %c0_i32, %c0_i32_0 : i32, i32, i32
  }
  func.func @transform_2(%arg0: i32) -> (i32, i32, i32) {
    %c0_i32 = arith.constant 0 : i32
    %c0_i32_0 = arith.constant 0 : i32
    %c0_i32_1 = arith.constant 0 : i32
    return %arg0, %c0_i32, %c0_i32_0 : i32, i32, i32
  }
  func.func @transform_3(%arg0: i32) -> (i32, i32) {
    %c0_i32 = arith.constant 0 : i32
    %c0_i32_0 = arith.constant 0 : i32
    %c0_i32_1 = arith.constant 0 : i32
    return %c0_i32, %c0_i32_0 : i32, i32
  }
  func.func @transform_4(%arg0: i32) -> (i32, i32) {
    %c0_i32 = arith.constant 0 : i32
    %c0_i32_0 = arith.constant 0 : i32
    %c0_i32_1 = arith.constant 0 : i32
    return %c0_i32, %c0_i32_0 : i32, i32
  }
  func.func @transform_5(%arg0: i32) -> (i32, i32) {
    %c0_i32 = arith.constant 0 : i32
    %c0_i32_0 = arith.constant 0 : i32
    %c0_i32_1 = arith.constant 0 : i32
    return %c0_i32, %c0_i32_0 : i32, i32
  }
  func.func @transform_6(%arg0: i32) -> (i32, i32) {
    %c0_i32 = arith.constant 0 : i32
    %c0_i32_0 = arith.constant 0 : i32
    %c0_i32_1 = arith.constant 0 : i32
    return %c0_i32, %c0_i32_0 : i32, i32
  }
  func.func @transform_7(%arg0: i32) -> (i32, i32) {
    %c0_i32 = arith.constant 0 : i32
    %c0_i32_0 = arith.constant 0 : i32
    %c0_i32_1 = arith.constant 0 : i32
    return %c0_i32, %c0_i32_0 : i32, i32
  }
  func.func @transform_8(%arg0: i32) -> (i32, i32) {
    %c0_i32 = arith.constant 0 : i32
    %c0_i32_0 = arith.constant 0 : i32
    %c0_i32_1 = arith.constant 0 : i32
    return %c0_i32, %c0_i32_0 : i32, i32
  }
  func.func @transform_9(%arg0: i32) -> (i32, i32, i32) {
    %c0_i32 = arith.constant 0 : i32
    %c0_i32_0 = arith.constant 0 : i32
    %c0_i32_1 = arith.constant 0 : i32
    return %arg0, %c0_i32, %c0_i32_0 : i32, i32, i32
  }
}

module attributes {stable_mosaic.version = 11 : i64} {
  func.func @_ffn_ln_kernel(%arg0: i32, %arg1: i32, %arg2: memref<8x32xf32, #tpu.memory_space<vmem>>, %arg3: memref<32x128xf32, #tpu.memory_space<vmem>>, %arg4: memref<1x128xf32, #tpu.memory_space<vmem>>, %arg5: memref<128x32xf32, #tpu.memory_space<vmem>>, %arg6: memref<1x32xf32, #tpu.memory_space<vmem>>, %arg7: memref<1x32xf32, #tpu.memory_space<vmem>>, %arg8: memref<1x32xf32, #tpu.memory_space<vmem>>, %arg9: memref<8x32xf32, #tpu.memory_space<vmem>>) attributes {dimension_semantics = [#tpu.dimension_semantics<parallel>, #tpu.dimension_semantics<arbitrary>], iteration_bounds = array<i64: 2, 1>, scalar_prefetch = 0 : i64, scratch_operands = 0 : i64, tpu.core_type = #tpu.core_type<tc>, window_params = [{transform_indices = @transform_0, window_bounds = array<i64: 8, 32>}, {transform_indices = @transform_1, window_bounds = array<i64: 32, 128>}, {transform_indices = @transform_2, window_bounds = array<i64: 1, 128>}, {transform_indices = @transform_3, window_bounds = array<i64: 128, 32>}, {pipeline_mode = #tpu.pipeline_mode<synchronous>, transform_indices = @transform_4, window_bounds = array<i64: 1, 32>}, {pipeline_mode = #tpu.pipeline_mode<synchronous>, transform_indices = @transform_5, window_bounds = array<i64: 1, 32>}, {pipeline_mode = #tpu.pipeline_mode<synchronous>, transform_indices = @transform_6, window_bounds = array<i64: 1, 32>}, {transform_indices = @transform_7, window_bounds = array<i64: 8, 32>}]} {
    %c0_i32 = arith.constant 0 : i32
    %0 = arith.cmpi eq, %arg1, %c0_i32 : i32
    %1 = arith.extui %0 : i1 to i32
    %c0_i32_0 = arith.constant 0 : i32
    %2 = arith.cmpi ne, %1, %c0_i32_0 : i32
    scf.if %2 {
      %cst_16 = arith.constant 0.000000e+00 : f32
      %19 = vector.broadcast %cst_16 : f32 to vector<8x32xf32>
      %c0_17 = arith.constant 0 : index
      %c0_18 = arith.constant 0 : index
      %20 = vector.load %arg9[%c0_17, %c0_18] : memref<8x32xf32, #tpu.memory_space<vmem>>, vector<8x32xf32>
      tpu.vector_store %arg9[%c0_17, %c0_18], %19 {strides = array<i32>} : memref<8x32xf32, #tpu.memory_space<vmem>>, vector<8x32xf32>,
    } else {
    }
    %c0 = arith.constant 0 : index
    %c0_1 = arith.constant 0 : index
    %3 = vector.load %arg2[%c0, %c0_1] : memref<8x32xf32, #tpu.memory_space<vmem>>, vector<8x32xf32>
    %c0_2 = arith.constant 0 : index
    %c0_3 = arith.constant 0 : index
    %4 = vector.load %arg3[%c0_2, %c0_3] : memref<32x128xf32, #tpu.memory_space<vmem>>, vector<32x128xf32>
    %cst = arith.constant dense<0.000000e+00> : vector<8x128xf32>
    %5 = tpu.matmul %3, %4, %cst {dimension_numbers = #tpu.dot_dimension_numbers<[1], [0], [0], [1], [0, 0, 1, 1], [], []>} : vector<8x32xf32>, vector<32x128xf32>, vector<8x128xf32> -> vector<8x128xf32>
    %c0_4 = arith.constant 0 : index
    %c0_5 = arith.constant 0 : index
    %6 = vector.load %arg4[%c0_4, %c0_5] : memref<1x128xf32, #tpu.memory_space<vmem>>, vector<1x128xf32>
    %7 = vector.broadcast %6 : vector<1x128xf32> to vector<8x128xf32>
    %8 = arith.addf %5, %7 : vector<8x128xf32>
    %cst_6 = arith.constant 0.000000e+00 : f32
    %9 = vector.broadcast %cst_6 : f32 to vector<8x128xf32>
    %10 = arith.maximumf %8, %9 : vector<8x128xf32>
    %c0_7 = arith.constant 0 : index
    %c0_8 = arith.constant 0 : index
    %11 = vector.load %arg9[%c0_7, %c0_8] : memref<8x32xf32, #tpu.memory_space<vmem>>, vector<8x32xf32>
    %c0_9 = arith.constant 0 : index
    %c0_10 = arith.constant 0 : index
    %12 = vector.load %arg5[%c0_9, %c0_10] : memref<128x32xf32, #tpu.memory_space<vmem>>, vector<128x32xf32>
    %cst_11 = arith.constant dense<0.000000e+00> : vector<8x32xf32>
    %13 = tpu.matmul %10, %12, %cst_11 {dimension_numbers = #tpu.dot_dimension_numbers<[1], [0], [0], [1], [0, 0, 1, 1], [], []>} : vector<8x128xf32>, vector<128x32xf32>, vector<8x32xf32> -> vector<8x32xf32>
    %14 = arith.addf %11, %13 : vector<8x32xf32>
    %c0_12 = arith.constant 0 : index
    %c0_13 = arith.constant 0 : index
    %15 = vector.load %arg9[%c0_12, %c0_13] : memref<8x32xf32, #tpu.memory_space<vmem>>, vector<8x32xf32>
    tpu.vector_store %arg9[%c0_12, %c0_13], %14 {strides = array<i32>} : memref<8x32xf32, #tpu.memory_space<vmem>>, vector<8x32xf32>,
    %c0_i32_14 = arith.constant 0 : i32
    %16 = arith.cmpi eq, %arg1, %c0_i32_14 : i32
    %17 = arith.extui %16 : i1 to i32
    %c0_i32_15 = arith.constant 0 : i32
    %18 = arith.cmpi ne, %17, %c0_i32_15 : i32
    scf.if %18 {
      %c0_16 = arith.constant 0 : index
      %c0_17 = arith.constant 0 : index
      %19 = vector.load %arg9[%c0_16, %c0_17] : memref<8x32xf32, #tpu.memory_space<vmem>>, vector<8x32xf32>
      %c0_18 = arith.constant 0 : index
      %c0_19 = arith.constant 0 : index
      %20 = vector.load %arg6[%c0_18, %c0_19] : memref<1x32xf32, #tpu.memory_space<vmem>>, vector<1x32xf32>
      %21 = vector.broadcast %20 : vector<1x32xf32> to vector<8x32xf32>
      %22 = arith.addf %19, %21 : vector<8x32xf32>
      %c0_20 = arith.constant 0 : index
      %c0_21 = arith.constant 0 : index
      %23 = vector.load %arg2[%c0_20, %c0_21] : memref<8x32xf32, #tpu.memory_space<vmem>>, vector<8x32xf32>
      %24 = arith.addf %22, %23 : vector<8x32xf32>
      %c0_22 = arith.constant 0 : index
      %c0_23 = arith.constant 0 : index
      %25 = vector.load %arg7[%c0_22, %c0_23] : memref<1x32xf32, #tpu.memory_space<vmem>>, vector<1x32xf32>
      %c0_24 = arith.constant 0 : index
      %c0_25 = arith.constant 0 : index
      %26 = vector.load %arg8[%c0_24, %c0_25] : memref<1x32xf32, #tpu.memory_space<vmem>>, vector<1x32xf32>
      %cst_26 = arith.constant dense<0.000000e+00> : vector<8xf32>
      %27 = vector.multi_reduction <add>, %24, %cst_26 [1] : vector<8x32xf32> to vector<8xf32>
      %28 = vector.shape_cast %27 : vector<8xf32> to vector<8x1xf32>
      %cst_27 = arith.constant 3.200000e+01 : f32
      %29 = vector.broadcast %cst_27 : f32 to vector<8x1xf32>
      %30 = arith.divf %28, %29 : vector<8x1xf32>
      %31 = vector.broadcast %30 : vector<8x1xf32> to vector<8x32xf32>
      %32 = arith.subf %24, %31 : vector<8x32xf32>
      %33 = arith.mulf %32, %32 : vector<8x32xf32>
      %cst_28 = arith.constant dense<0.000000e+00> : vector<8xf32>
      %34 = vector.multi_reduction <add>, %33, %cst_28 [1] : vector<8x32xf32> to vector<8xf32>
      %35 = vector.shape_cast %34 : vector<8xf32> to vector<8x1xf32>
      %cst_29 = arith.constant 3.200000e+01 : f32
      %36 = vector.broadcast %cst_29 : f32 to vector<8x1xf32>
      %37 = arith.divf %35, %36 : vector<8x1xf32>
      %38 = vector.broadcast %30 : vector<8x1xf32> to vector<8x32xf32>
      %39 = arith.subf %24, %38 : vector<8x32xf32>
      %cst_30 = arith.constant 9.99999974E-6 : f32
      %40 = vector.broadcast %cst_30 : f32 to vector<8x1xf32>
      %41 = arith.addf %37, %40 : vector<8x1xf32>
      %42 = math.rsqrt %41 : vector<8x1xf32>
      %43 = vector.broadcast %42 : vector<8x1xf32> to vector<8x32xf32>
      %44 = arith.mulf %39, %43 : vector<8x32xf32>
      %45 = vector.broadcast %25 : vector<1x32xf32> to vector<8x32xf32>
      %46 = arith.mulf %44, %45 : vector<8x32xf32>
      %47 = vector.broadcast %26 : vector<1x32xf32> to vector<8x32xf32>
      %48 = arith.addf %46, %47 : vector<8x32xf32>
      %c0_31 = arith.constant 0 : index
      %c0_32 = arith.constant 0 : index
      %49 = vector.load %arg9[%c0_31, %c0_32] : memref<8x32xf32, #tpu.memory_space<vmem>>, vector<8x32xf32>
      tpu.vector_store %arg9[%c0_31, %c0_32], %48 {strides = array<i32>} : memref<8x32xf32, #tpu.memory_space<vmem>>, vector<8x32xf32>,
    } else {
    }
    return
  }
  func.func @transform_0(%arg0: i32, %arg1: i32) -> (i32, i32) {
    %c0_i32 = arith.constant 0 : i32
    %c0_i32_0 = arith.constant 0 : i32
    return %arg0, %c0_i32 : i32, i32
  }
  func.func @transform_1(%arg0: i32, %arg1: i32) -> (i32, i32) {
    %c0_i32 = arith.constant 0 : i32
    %c0_i32_0 = arith.constant 0 : i32
    return %c0_i32, %arg1 : i32, i32
  }
  func.func @transform_2(%arg0: i32, %arg1: i32) -> (i32, i32) {
    %c0_i32 = arith.constant 0 : i32
    %c0_i32_0 = arith.constant 0 : i32
    return %c0_i32, %arg1 : i32, i32
  }
  func.func @transform_3(%arg0: i32, %arg1: i32) -> (i32, i32) {
    %c0_i32 = arith.constant 0 : i32
    %c0_i32_0 = arith.constant 0 : i32
    return %arg1, %c0_i32 : i32, i32
  }
  func.func @transform_4(%arg0: i32, %arg1: i32) -> (i32, i32) {
    %c0_i32 = arith.constant 0 : i32
    %c0_i32_0 = arith.constant 0 : i32
    %c0_i32_1 = arith.constant 0 : i32
    return %c0_i32, %c0_i32_0 : i32, i32
  }
  func.func @transform_5(%arg0: i32, %arg1: i32) -> (i32, i32) {
    %c0_i32 = arith.constant 0 : i32
    %c0_i32_0 = arith.constant 0 : i32
    %c0_i32_1 = arith.constant 0 : i32
    return %c0_i32, %c0_i32_0 : i32, i32
  }
  func.func @transform_6(%arg0: i32, %arg1: i32) -> (i32, i32) {
    %c0_i32 = arith.constant 0 : i32
    %c0_i32_0 = arith.constant 0 : i32
    %c0_i32_1 = arith.constant 0 : i32
    return %c0_i32, %c0_i32_0 : i32, i32
  }
  func.func @transform_7(%arg0: i32, %arg1: i32) -> (i32, i32) {
    %c0_i32 = arith.constant 0 : i32
    %c0_i32_0 = arith.constant 0 : i32
    return %arg0, %c0_i32 : i32, i32
  }
}

module attributes {stable_mosaic.version = 11 : i64} {
  func.func @_linear_bias_kernel(%arg0: i32, %arg1: i32, %arg2: memref<8x32xf32, #tpu.memory_space<vmem>>, %arg3: memref<32x40xf32, #tpu.memory_space<vmem>>, %arg4: memref<1x40xf32, #tpu.memory_space<vmem>>, %arg5: memref<8x40xf32, #tpu.memory_space<vmem>>) attributes {dimension_semantics = [#tpu.dimension_semantics<parallel>, #tpu.dimension_semantics<parallel>], iteration_bounds = array<i64: 2, 1>, scalar_prefetch = 0 : i64, scratch_operands = 0 : i64, tpu.core_type = #tpu.core_type<tc>, window_params = [{transform_indices = @transform_0, window_bounds = array<i64: 8, 32>}, {transform_indices = @transform_1, window_bounds = array<i64: 32, 40>}, {transform_indices = @transform_2, window_bounds = array<i64: 1, 40>}, {transform_indices = @transform_3, window_bounds = array<i64: 8, 40>}]} {
    %c0 = arith.constant 0 : index
    %c0_0 = arith.constant 0 : index
    %0 = vector.load %arg2[%c0, %c0_0] : memref<8x32xf32, #tpu.memory_space<vmem>>, vector<8x32xf32>
    %c0_1 = arith.constant 0 : index
    %c0_2 = arith.constant 0 : index
    %1 = vector.load %arg3[%c0_1, %c0_2] : memref<32x40xf32, #tpu.memory_space<vmem>>, vector<32x40xf32>
    %cst = arith.constant dense<0.000000e+00> : vector<8x40xf32>
    %2 = tpu.matmul %0, %1, %cst {dimension_numbers = #tpu.dot_dimension_numbers<[1], [0], [0], [1], [0, 0, 1, 1], [], []>} : vector<8x32xf32>, vector<32x40xf32>, vector<8x40xf32> -> vector<8x40xf32>
    %c0_3 = arith.constant 0 : index
    %c0_4 = arith.constant 0 : index
    %3 = vector.load %arg4[%c0_3, %c0_4] : memref<1x40xf32, #tpu.memory_space<vmem>>, vector<1x40xf32>
    %4 = vector.broadcast %3 : vector<1x40xf32> to vector<8x40xf32>
    %5 = arith.addf %2, %4 : vector<8x40xf32>
    %c0_5 = arith.constant 0 : index
    %c0_6 = arith.constant 0 : index
    %6 = vector.load %arg5[%c0_5, %c0_6] : memref<8x40xf32, #tpu.memory_space<vmem>>, vector<8x40xf32>
    tpu.vector_store %arg5[%c0_5, %c0_6], %5 {strides = array<i32>} : memref<8x40xf32, #tpu.memory_space<vmem>>, vector<8x40xf32>,
    return
  }
  func.func @transform_0(%arg0: i32, %arg1: i32) -> (i32, i32) {
    %c0_i32 = arith.constant 0 : i32
    %c0_i32_0 = arith.constant 0 : i32
    return %arg0, %c0_i32 : i32, i32
  }
  func.func @transform_1(%arg0: i32, %arg1: i32) -> (i32, i32) {
    %c0_i32 = arith.constant 0 : i32
    %c0_i32_0 = arith.constant 0 : i32
    return %c0_i32, %arg1 : i32, i32
  }
  func.func @transform_2(%arg0: i32, %arg1: i32) -> (i32, i32) {
    %c0_i32 = arith.constant 0 : i32
    %c0_i32_0 = arith.constant 0 : i32
    return %c0_i32, %arg1 : i32, i32
  }
  func.func @transform_3(%arg0: i32, %arg1: i32) -> (i32, i32) {
    %c0_i32 = arith.constant 0 : i32
    return %arg0, %arg1 : i32, i32
  }
}

module attributes {stable_mosaic.version = 11 : i64} {
  func.func @_attn_block_kernel(%arg0: i32, %arg1: memref<1x8x32xf32, #tpu.memory_space<vmem>>, %arg2: memref<1x8x32xf32, #tpu.memory_space<vmem>>, %arg3: memref<32x32xf32, #tpu.memory_space<vmem>>, %arg4: memref<32x64xf32, #tpu.memory_space<vmem>>, %arg5: memref<32x32xf32, #tpu.memory_space<vmem>>, %arg6: memref<1x32xf32, #tpu.memory_space<vmem>>, %arg7: memref<1x32xf32, #tpu.memory_space<vmem>>, %arg8: memref<1x32xf32, #tpu.memory_space<vmem>>, %arg9: memref<1x8x32xf32, #tpu.memory_space<vmem>>) attributes {dimension_semantics = [#tpu.dimension_semantics<parallel>], iteration_bounds = array<i64: 2>, scalar_prefetch = 0 : i64, scratch_operands = 0 : i64, tpu.core_type = #tpu.core_type<tc>, window_params = [{transform_indices = @transform_0, window_bounds = array<i64: 1, 8, 32>}, {transform_indices = @transform_1, window_bounds = array<i64: 1, 8, 32>}, {pipeline_mode = #tpu.pipeline_mode<synchronous>, transform_indices = @transform_2, window_bounds = array<i64: 32, 32>}, {pipeline_mode = #tpu.pipeline_mode<synchronous>, transform_indices = @transform_3, window_bounds = array<i64: 32, 64>}, {pipeline_mode = #tpu.pipeline_mode<synchronous>, transform_indices = @transform_4, window_bounds = array<i64: 32, 32>}, {pipeline_mode = #tpu.pipeline_mode<synchronous>, transform_indices = @transform_5, window_bounds = array<i64: 1, 32>}, {pipeline_mode = #tpu.pipeline_mode<synchronous>, transform_indices = @transform_6, window_bounds = array<i64: 1, 32>}, {pipeline_mode = #tpu.pipeline_mode<synchronous>, transform_indices = @transform_7, window_bounds = array<i64: 1, 32>}, {transform_indices = @transform_8, window_bounds = array<i64: 1, 8, 32>}]} {
    %c0 = arith.constant 0 : index
    %c0_0 = arith.constant 0 : index
    %c0_1 = arith.constant 0 : index
    %0 = vector.load %arg2[%c0, %c0_0, %c0_1] : memref<1x8x32xf32, #tpu.memory_space<vmem>>, vector<1x8x32xf32>
    %1 = vector.shape_cast %0 : vector<1x8x32xf32> to vector<8x32xf32>
    %c0_2 = arith.constant 0 : index
    %c0_3 = arith.constant 0 : index
    %c0_4 = arith.constant 0 : index
    %2 = vector.load %arg1[%c0_2, %c0_3, %c0_4] : memref<1x8x32xf32, #tpu.memory_space<vmem>>, vector<1x8x32xf32>
    %3 = vector.shape_cast %2 : vector<1x8x32xf32> to vector<8x32xf32>
    %c0_5 = arith.constant 0 : index
    %c0_6 = arith.constant 0 : index
    %4 = vector.load %arg3[%c0_5, %c0_6] : memref<32x32xf32, #tpu.memory_space<vmem>>, vector<32x32xf32>
    %cst = arith.constant dense<0.000000e+00> : vector<8x32xf32>
    %5 = tpu.matmul %1, %4, %cst {dimension_numbers = #tpu.dot_dimension_numbers<[1], [0], [0], [1], [0, 0, 1, 1], [], []>} : vector<8x32xf32>, vector<32x32xf32>, vector<8x32xf32> -> vector<8x32xf32>
    %c0_7 = arith.constant 0 : index
    %c0_8 = arith.constant 0 : index
    %6 = vector.load %arg4[%c0_7, %c0_8] : memref<32x64xf32, #tpu.memory_space<vmem>>, vector<32x64xf32>
    %cst_9 = arith.constant dense<0.000000e+00> : vector<8x64xf32>
    %7 = tpu.matmul %3, %6, %cst_9 {dimension_numbers = #tpu.dot_dimension_numbers<[1], [0], [0], [1], [0, 0, 1, 1], [], []>} : vector<8x32xf32>, vector<32x64xf32>, vector<8x64xf32> -> vector<8x64xf32>
    %8 = tpu.iota {dimensions = array<i32: 0>} : vector<8x8xi32>
    %9 = tpu.iota {dimensions = array<i32: 1>} : vector<8x8xi32>
    %10 = arith.cmpi sge, %8, %9 : vector<8x8xi32>
    %11 = vector.extract_strided_slice %5 {offsets = [0, 0], sizes = [8, 8], strides = [1, 1]} : vector<8x32xf32> to vector<8x8xf32>
    %12 = vector.extract_strided_slice %7 {offsets = [0, 0], sizes = [8, 8], strides = [1, 1]} : vector<8x64xf32> to vector<8x8xf32>
    %13 = vector.extract_strided_slice %7 {offsets = [0, 32], sizes = [8, 8], strides = [1, 1]} : vector<8x64xf32> to vector<8x8xf32>
    %cst_10 = arith.constant dense<0.000000e+00> : vector<8x8xf32>
    %14 = tpu.matmul %11, %12, %cst_10 {dimension_numbers = #tpu.dot_dimension_numbers<[1], [1], [0], [0], [0, 0, 1, 0], [], []>} : vector<8x8xf32>, vector<8x8xf32>, vector<8x8xf32> -> vector<8x8xf32>
    %cst_11 = arith.constant -1.000000e+20 : f32
    %15 = vector.broadcast %cst_11 : f32 to vector<8x8xf32>
    %16 = arith.select %10, %14, %15 : vector<8x8xi1>, vector<8x8xf32>
    %cst_12 = arith.constant 0.176776692 : f32
    %17 = vector.broadcast %cst_12 : f32 to vector<8x8xf32>
    %18 = arith.mulf %16, %17 : vector<8x8xf32>
    %cst_13 = arith.constant dense<0xFF800000> : vector<8xf32>
    %19 = vector.multi_reduction <maximumf>, %18, %cst_13 [1] : vector<8x8xf32> to vector<8xf32>
    %20 = vector.shape_cast %19 : vector<8xf32> to vector<8x1xf32>
    %21 = vector.broadcast %20 : vector<8x1xf32> to vector<8x8xf32>
    %22 = arith.subf %18, %21 : vector<8x8xf32>
    %23 = math.exp %22 : vector<8x8xf32>
    %cst_14 = arith.constant dense<0.000000e+00> : vector<8xf32>
    %24 = vector.multi_reduction <add>, %23, %cst_14 [1] : vector<8x8xf32> to vector<8xf32>
    %25 = vector.shape_cast %24 : vector<8xf32> to vector<8x1xf32>
    %26 = tpu.reciprocal %25 {approx = true} : vector<8x1xf32> -> vector<8x1xf32>
    %27 = vector.broadcast %26 : vector<8x1xf32> to vector<8x8xf32>
    %28 = arith.mulf %23, %27 : vector<8x8xf32>
    %cst_15 = arith.constant dense<0.000000e+00> : vector<8x8xf32>
    %29 = tpu.matmul %28, %13, %cst_15 {dimension_numbers = #tpu.dot_dimension_numbers<[1], [0], [0], [1], [0, 0, 1, 1], [], []>} : vector<8x8xf32>, vector<8x8xf32>, vector<8x8xf32> -> vector<8x8xf32>
    %30 = vector.extract_strided_slice %5 {offsets = [0, 8], sizes = [8, 8], strides = [1, 1]} : vector<8x32xf32> to vector<8x8xf32>
    %31 = vector.extract_strided_slice %7 {offsets = [0, 8], sizes = [8, 8], strides = [1, 1]} : vector<8x64xf32> to vector<8x8xf32>
    %32 = vector.extract_strided_slice %7 {offsets = [0, 40], sizes = [8, 8], strides = [1, 1]} : vector<8x64xf32> to vector<8x8xf32>
    %cst_16 = arith.constant dense<0.000000e+00> : vector<8x8xf32>
    %33 = tpu.matmul %30, %31, %cst_16 {dimension_numbers = #tpu.dot_dimension_numbers<[1], [1], [0], [0], [0, 0, 1, 0], [], []>} : vector<8x8xf32>, vector<8x8xf32>, vector<8x8xf32> -> vector<8x8xf32>
    %cst_17 = arith.constant -1.000000e+20 : f32
    %34 = vector.broadcast %cst_17 : f32 to vector<8x8xf32>
    %35 = arith.select %10, %33, %34 : vector<8x8xi1>, vector<8x8xf32>
    %cst_18 = arith.constant 0.176776692 : f32
    %36 = vector.broadcast %cst_18 : f32 to vector<8x8xf32>
    %37 = arith.mulf %35, %36 : vector<8x8xf32>
    %cst_19 = arith.constant dense<0xFF800000> : vector<8xf32>
    %38 = vector.multi_reduction <maximumf>, %37, %cst_19 [1] : vector<8x8xf32> to vector<8xf32>
    %39 = vector.shape_cast %38 : vector<8xf32> to vector<8x1xf32>
    %40 = vector.broadcast %39 : vector<8x1xf32> to vector<8x8xf32>
    %41 = arith.subf %37, %40 : vector<8x8xf32>
    %42 = math.exp %41 : vector<8x8xf32>
    %cst_20 = arith.constant dense<0.000000e+00> : vector<8xf32>
    %43 = vector.multi_reduction <add>, %42, %cst_20 [1] : vector<8x8xf32> to vector<8xf32>
    %44 = vector.shape_cast %43 : vector<8xf32> to vector<8x1xf32>
    %45 = tpu.reciprocal %44 {approx = true} : vector<8x1xf32> -> vector<8x1xf32>
    %46 = vector.broadcast %45 : vector<8x1xf32> to vector<8x8xf32>
    %47 = arith.mulf %42, %46 : vector<8x8xf32>
    %cst_21 = arith.constant dense<0.000000e+00> : vector<8x8xf32>
    %48 = tpu.matmul %47, %32, %cst_21 {dimension_numbers = #tpu.dot_dimension_numbers<[1], [0], [0], [1], [0, 0, 1, 1], [], []>} : vector<8x8xf32>, vector<8x8xf32>, vector<8x8xf32> -> vector<8x8xf32>
    %49 = vector.extract_strided_slice %5 {offsets = [0, 16], sizes = [8, 8], strides = [1, 1]} : vector<8x32xf32> to vector<8x8xf32>
    %50 = vector.extract_strided_slice %7 {offsets = [0, 16], sizes = [8, 8], strides = [1, 1]} : vector<8x64xf32> to vector<8x8xf32>
    %51 = vector.extract_strided_slice %7 {offsets = [0, 48], sizes = [8, 8], strides = [1, 1]} : vector<8x64xf32> to vector<8x8xf32>
    %cst_22 = arith.constant dense<0.000000e+00> : vector<8x8xf32>
    %52 = tpu.matmul %49, %50, %cst_22 {dimension_numbers = #tpu.dot_dimension_numbers<[1], [1], [0], [0], [0, 0, 1, 0], [], []>} : vector<8x8xf32>, vector<8x8xf32>, vector<8x8xf32> -> vector<8x8xf32>
    %cst_23 = arith.constant -1.000000e+20 : f32
    %53 = vector.broadcast %cst_23 : f32 to vector<8x8xf32>
    %54 = arith.select %10, %52, %53 : vector<8x8xi1>, vector<8x8xf32>
    %cst_24 = arith.constant 0.176776692 : f32
    %55 = vector.broadcast %cst_24 : f32 to vector<8x8xf32>
    %56 = arith.mulf %54, %55 : vector<8x8xf32>
    %cst_25 = arith.constant dense<0xFF800000> : vector<8xf32>
    %57 = vector.multi_reduction <maximumf>, %56, %cst_25 [1] : vector<8x8xf32> to vector<8xf32>
    %58 = vector.shape_cast %57 : vector<8xf32> to vector<8x1xf32>
    %59 = vector.broadcast %58 : vector<8x1xf32> to vector<8x8xf32>
    %60 = arith.subf %56, %59 : vector<8x8xf32>
    %61 = math.exp %60 : vector<8x8xf32>
    %cst_26 = arith.constant dense<0.000000e+00> : vector<8xf32>
    %62 = vector.multi_reduction <add>, %61, %cst_26 [1] : vector<8x8xf32> to vector<8xf32>
    %63 = vector.shape_cast %62 : vector<8xf32> to vector<8x1xf32>
    %64 = tpu.reciprocal %63 {approx = true} : vector<8x1xf32> -> vector<8x1xf32>
    %65 = vector.broadcast %64 : vector<8x1xf32> to vector<8x8xf32>
    %66 = arith.mulf %61, %65 : vector<8x8xf32>
    %cst_27 = arith.constant dense<0.000000e+00> : vector<8x8xf32>
    %67 = tpu.matmul %66, %51, %cst_27 {dimension_numbers = #tpu.dot_dimension_numbers<[1], [0], [0], [1], [0, 0, 1, 1], [], []>} : vector<8x8xf32>, vector<8x8xf32>, vector<8x8xf32> -> vector<8x8xf32>
    %68 = vector.extract_strided_slice %5 {offsets = [0, 24], sizes = [8, 8], strides = [1, 1]} : vector<8x32xf32> to vector<8x8xf32>
    %69 = vector.extract_strided_slice %7 {offsets = [0, 24], sizes = [8, 8], strides = [1, 1]} : vector<8x64xf32> to vector<8x8xf32>
    %70 = vector.extract_strided_slice %7 {offsets = [0, 56], sizes = [8, 8], strides = [1, 1]} : vector<8x64xf32> to vector<8x8xf32>
    %cst_28 = arith.constant dense<0.000000e+00> : vector<8x8xf32>
    %71 = tpu.matmul %68, %69, %cst_28 {dimension_numbers = #tpu.dot_dimension_numbers<[1], [1], [0], [0], [0, 0, 1, 0], [], []>} : vector<8x8xf32>, vector<8x8xf32>, vector<8x8xf32> -> vector<8x8xf32>
    %cst_29 = arith.constant -1.000000e+20 : f32
    %72 = vector.broadcast %cst_29 : f32 to vector<8x8xf32>
    %73 = arith.select %10, %71, %72 : vector<8x8xi1>, vector<8x8xf32>
    %cst_30 = arith.constant 0.176776692 : f32
    %74 = vector.broadcast %cst_30 : f32 to vector<8x8xf32>
    %75 = arith.mulf %73, %74 : vector<8x8xf32>
    %cst_31 = arith.constant dense<0xFF800000> : vector<8xf32>
    %76 = vector.multi_reduction <maximumf>, %75, %cst_31 [1] : vector<8x8xf32> to vector<8xf32>
    %77 = vector.shape_cast %76 : vector<8xf32> to vector<8x1xf32>
    %78 = vector.broadcast %77 : vector<8x1xf32> to vector<8x8xf32>
    %79 = arith.subf %75, %78 : vector<8x8xf32>
    %80 = math.exp %79 : vector<8x8xf32>
    %cst_32 = arith.constant dense<0.000000e+00> : vector<8xf32>
    %81 = vector.multi_reduction <add>, %80, %cst_32 [1] : vector<8x8xf32> to vector<8xf32>
    %82 = vector.shape_cast %81 : vector<8xf32> to vector<8x1xf32>
    %83 = tpu.reciprocal %82 {approx = true} : vector<8x1xf32> -> vector<8x1xf32>
    %84 = vector.broadcast %83 : vector<8x1xf32> to vector<8x8xf32>
    %85 = arith.mulf %80, %84 : vector<8x8xf32>
    %cst_33 = arith.constant dense<0.000000e+00> : vector<8x8xf32>
    %86 = tpu.matmul %85, %70, %cst_33 {dimension_numbers = #tpu.dot_dimension_numbers<[1], [0], [0], [1], [0, 0, 1, 1], [], []>} : vector<8x8xf32>, vector<8x8xf32>, vector<8x8xf32> -> vector<8x8xf32>
    %87 = tpu.concatenate %29, %48, %67, %86 in 1 : vector<8x8xf32>, vector<8x8xf32>, vector<8x8xf32>, vector<8x8xf32> -> vector<8x32xf32>
    %c0_34 = arith.constant 0 : index
    %c0_35 = arith.constant 0 : index
    %88 = vector.load %arg5[%c0_34, %c0_35] : memref<32x32xf32, #tpu.memory_space<vmem>>, vector<32x32xf32>
    %cst_36 = arith.constant dense<0.000000e+00> : vector<8x32xf32>
    %89 = tpu.matmul %87, %88, %cst_36 {dimension_numbers = #tpu.dot_dimension_numbers<[1], [0], [0], [1], [0, 0, 1, 1], [], []>} : vector<8x32xf32>, vector<32x32xf32>, vector<8x32xf32> -> vector<8x32xf32>
    %c0_37 = arith.constant 0 : index
    %c0_38 = arith.constant 0 : index
    %90 = vector.load %arg6[%c0_37, %c0_38] : memref<1x32xf32, #tpu.memory_space<vmem>>, vector<1x32xf32>
    %91 = vector.broadcast %90 : vector<1x32xf32> to vector<8x32xf32>
    %92 = arith.addf %89, %91 : vector<8x32xf32>
    %93 = arith.addf %92, %1 : vector<8x32xf32>
    %c0_39 = arith.constant 0 : index
    %c0_40 = arith.constant 0 : index
    %94 = vector.load %arg7[%c0_39, %c0_40] : memref<1x32xf32, #tpu.memory_space<vmem>>, vector<1x32xf32>
    %c0_41 = arith.constant 0 : index
    %c0_42 = arith.constant 0 : index
    %95 = vector.load %arg8[%c0_41, %c0_42] : memref<1x32xf32, #tpu.memory_space<vmem>>, vector<1x32xf32>
    %cst_43 = arith.constant dense<0.000000e+00> : vector<8xf32>
    %96 = vector.multi_reduction <add>, %93, %cst_43 [1] : vector<8x32xf32> to vector<8xf32>
    %97 = vector.shape_cast %96 : vector<8xf32> to vector<8x1xf32>
    %cst_44 = arith.constant 3.200000e+01 : f32
    %98 = vector.broadcast %cst_44 : f32 to vector<8x1xf32>
    %99 = arith.divf %97, %98 : vector<8x1xf32>
    %100 = vector.broadcast %99 : vector<8x1xf32> to vector<8x32xf32>
    %101 = arith.subf %93, %100 : vector<8x32xf32>
    %102 = arith.mulf %101, %101 : vector<8x32xf32>
    %cst_45 = arith.constant dense<0.000000e+00> : vector<8xf32>
    %103 = vector.multi_reduction <add>, %102, %cst_45 [1] : vector<8x32xf32> to vector<8xf32>
    %104 = vector.shape_cast %103 : vector<8xf32> to vector<8x1xf32>
    %cst_46 = arith.constant 3.200000e+01 : f32
    %105 = vector.broadcast %cst_46 : f32 to vector<8x1xf32>
    %106 = arith.divf %104, %105 : vector<8x1xf32>
    %107 = vector.broadcast %99 : vector<8x1xf32> to vector<8x32xf32>
    %108 = arith.subf %93, %107 : vector<8x32xf32>
    %cst_47 = arith.constant 9.99999974E-6 : f32
    %109 = vector.broadcast %cst_47 : f32 to vector<8x1xf32>
    %110 = arith.addf %106, %109 : vector<8x1xf32>
    %111 = math.rsqrt %110 : vector<8x1xf32>
    %112 = vector.broadcast %111 : vector<8x1xf32> to vector<8x32xf32>
    %113 = arith.mulf %108, %112 : vector<8x32xf32>
    %114 = vector.broadcast %94 : vector<1x32xf32> to vector<8x32xf32>
    %115 = arith.mulf %113, %114 : vector<8x32xf32>
    %116 = vector.broadcast %95 : vector<1x32xf32> to vector<8x32xf32>
    %117 = arith.addf %115, %116 : vector<8x32xf32>
    %c0_48 = arith.constant 0 : index
    %c0_49 = arith.constant 0 : index
    %c0_50 = arith.constant 0 : index
    %118 = vector.load %arg9[%c0_48, %c0_49, %c0_50] : memref<1x8x32xf32, #tpu.memory_space<vmem>>, vector<1x8x32xf32>
    %119 = vector.shape_cast %118 : vector<1x8x32xf32> to vector<8x32xf32>
    %120 = vector.shape_cast %117 : vector<8x32xf32> to vector<1x8x32xf32>
    tpu.vector_store %arg9[%c0_48, %c0_49, %c0_50], %120 {strides = array<i32>} : memref<1x8x32xf32, #tpu.memory_space<vmem>>, vector<1x8x32xf32>,
    return
  }
  func.func @transform_0(%arg0: i32) -> (i32, i32, i32) {
    %c0_i32 = arith.constant 0 : i32
    %c0_i32_0 = arith.constant 0 : i32
    %c0_i32_1 = arith.constant 0 : i32
    return %arg0, %c0_i32, %c0_i32_0 : i32, i32, i32
  }
  func.func @transform_1(%arg0: i32) -> (i32, i32, i32) {
    %c0_i32 = arith.constant 0 : i32
    %c0_i32_0 = arith.constant 0 : i32
    %c0_i32_1 = arith.constant 0 : i32
    return %arg0, %c0_i32, %c0_i32_0 : i32, i32, i32
  }
  func.func @transform_2(%arg0: i32) -> (i32, i32) {
    %c0_i32 = arith.constant 0 : i32
    %c0_i32_0 = arith.constant 0 : i32
    %c0_i32_1 = arith.constant 0 : i32
    return %c0_i32, %c0_i32_0 : i32, i32
  }
  func.func @transform_3(%arg0: i32) -> (i32, i32) {
    %c0_i32 = arith.constant 0 : i32
    %c0_i32_0 = arith.constant 0 : i32
    %c0_i32_1 = arith.constant 0 : i32
    return %c0_i32, %c0_i32_0 : i32, i32
  }
  func.func @transform_4(%arg0: i32) -> (i32, i32) {
    %c0_i32 = arith.constant 0 : i32
    %c0_i32_0 = arith.constant 0 : i32
    %c0_i32_1 = arith.constant 0 : i32
    return %c0_i32, %c0_i32_0 : i32, i32
  }
  func.func @transform_5(%arg0: i32) -> (i32, i32) {
    %c0_i32 = arith.constant 0 : i32
    %c0_i32_0 = arith.constant 0 : i32
    %c0_i32_1 = arith.constant 0 : i32
    return %c0_i32, %c0_i32_0 : i32, i32
  }
  func.func @transform_6(%arg0: i32) -> (i32, i32) {
    %c0_i32 = arith.constant 0 : i32
    %c0_i32_0 = arith.constant 0 : i32
    %c0_i32_1 = arith.constant 0 : i32
    return %c0_i32, %c0_i32_0 : i32, i32
  }
  func.func @transform_7(%arg0: i32) -> (i32, i32) {
    %c0_i32 = arith.constant 0 : i32
    %c0_i32_0 = arith.constant 0 : i32
    %c0_i32_1 = arith.constant 0 : i32
    return %c0_i32, %c0_i32_0 : i32, i32
  }
  func.func @transform_8(%arg0: i32) -> (i32, i32, i32) {
    %c0_i32 = arith.constant 0 : i32
    %c0_i32_0 = arith.constant 0 : i32
    %c0_i32_1 = arith.constant 0 : i32
    return %arg0, %c0_i32, %c0_i32_0 : i32, i32, i32
  }
}

</mosaic_0001>

<bundles_post_ra>
// kernel: _lambda_.21
= control target key start
LH: loop header
LB: loop body
LE: loop exit
PB: predicated region body
PF: predicated region fallthrough
CT: control target
= control target key end

     0   :  { %8 = vsyncpa [#allocation3], 0  ;;  %s735_s0 = inlined_call_operand.vmem [shape: f32[16,32], index: 0, kind: input, shape index: {}]   ;;  %s736_s1 = inlined_call_operand.vmem [shape: f32[32,40], index: 1, kind: input, shape index: {}]   ;;  %s737_s2 = inlined_call_operand.vmem [shape: f32[1,40], index: 2, kind: input, shape index: {}]   ;;  %s738_s3 = inlined_call_operand.hbm [shape: f32[16,40], index: 3, kind: output, shape index: {}]  }
   0x1   :  { %10 = vsyncpa [#allocation3 + $0x1], 0  ;;  %s608_s12 = smov 0   ;;  %s610_s13 = smov 0  }
   0x2   :  { %s612_s14 = smov 0   ;;  %s614_s15 = smov 0  }
   0x3   :  { %s616_s16 = smov 0   ;;  %s618_s17 = smov 0  }
   0x4 LB: > { %s409_s18 = sadd.s32 4294967295, %s582_s17   ;;  %s410_s19 = sadd.s32 4294967294, %s582_s17   ;;  %s582_s17 = sphi %s618_s17, %s16_s17   ;;  %s578_s16 = sphi %s616_s16, %s745_s16   ;;  %s574_s15 = sphi %s614_s15, %s744_s15   ;;  %s570_s14 = sphi %s612_s14, %s743_s14   ;;  %s566_s13 = sphi %s610_s13, %s742_s13   ;;  %s562_s12 = sphi %s608_s12, %s741_s12  }
   0x5   : > { %s28_s20 = sadd.s32 1, %s578_s16  ;;  %s115_s21 = sadd.s32 1, %s570_s14 }
   0x6   : > { %p30_p0 = scmp.ge.s32.totalorder %s28_s20, 2  ;;  %p125_p1 = scmp.ne.s32.totalorder %s570_s14, %s566_s13 }
   0x7   : > { %p126_p2 = scmp.eq.s32.totalorder %s409_s18, 1  ;;  %p131_p3 = scmp.ne.s32.totalorder %s566_s13, %s562_s12 }
   0x8   : > { %s747_s20 = smov (%p30_p0, %s28_s20), 0  ;;  %p132_p5 = scmp.eq.s32.totalorder %s410_s19, 1 }
   0x9   : > { %p648_p4 = por %p126_p2, %p125_p1  ;;  %s110_s23 = ssub.s32 %s578_s16, %s747_s20 }
   0xa   : > { %p415_p6 = scmp.ge.s32.totalorder %s582_s17, 1  ;;  %p113_p7 = scmp.eq.s32.totalorder %s110_s23, 0 }
   0xb   : > { %p655_p8 = por %p132_p5, %p131_p3  ;;  %p170_p9 = scmp.lt.s32.totalorder %s582_s17, 3 }
   0xc   : > { %s661_s25 = scalar_select %p113_p7, %s570_s14, %s115_s21  }
   0xd   : > { %p171_p10 = pnand %p415_p6, %p170_p9 }
   0xe   : > { %v212_v0 = vld [vmem:[%s736_s1] sm:$0xff] (!%p171_p10)  ;;  %v213_v1 = vld [vmem:[%s736_s1 + $0x8] sm:$0xff] (!%p171_p10)  ;;  %v214_v2 = vld [vmem:[%s736_s1 + $0x10] sm:$0xff] (!%p171_p10)  ;;  %v584_v3 = vmov (!%p171_p10), 0.0|0.0   ;;  %vm585_vm0 = vmmov (!%p171_p10), 0   ;;  %v586_v6 = vmov (!%p171_p10), 0.0  }
   0xf   : > { %174 = sbr.rel (%p171_p10) target bundleno = 255 (0xff), region = 32  ;;  %440 = vmatprep.subr.bf16.mxu0 (!%p171_p10), %v584_v3  ;;  %v441_v4 = vpack.c.bf16 (!%p171_p10), %v213_v1, %v212_v0  ;;  %v215_v5 = vld [vmem:[%s736_s1 + $0x18] sm:$0xff] (!%p171_p10)  ;;  %437 = vmatprep.mubr.msk.f32.mxu0 (!%p171_p10), %vm585_vm0, %v586_v6  ;;  %p200_p11 = scmp.lt.s32.totalorder (!%p171_p10), %s574_s15, 1  ;;  %vm223_vm1 = vcmask (!%p171_p10), 261120   ;;  %v418_v9 = vld [vmem:[%s737_s2] ss:$0 sm:$0xff] (!%p171_p10) }
  0x10   : > { %v444_v7 = vpack.c.bf16 (!%p171_p10), %v215_v5, %v214_v2  ;;  %s197_s18 = sand.u32 (!%p171_p10), 1, %s566_s13   ;;  %s421_s26 = sshll.u32 (!%p171_p10), %s574_s15, 7  ;;  %vm297_vm2 = vcmask (!%p171_p10), 326656  }
  0x11   : > { %442 = vmatpush3.bf16.msra.mxu0 (!%p171_p10), %v441_v4  ;;  %s416_s19 = sshll.u32 (!%p171_p10), %s197_s18, 3  ;;  %s688_s4 = scalar_lea.hbm (!%p171_p10), %s738_s3, %s421_s26 }
  0x12   : > { %443 = vmatprep.subr.bf16.mxu0 (!%p171_p10), %v584_v3  ;;  %s199_s27 = scalar_lea.vmem (!%p171_p10), [#allocation2], %s416_s19  ;;  %s300_s5 = scalar_lea.sflag (!%p171_p10), [#allocation3], %s197_s18 }
  0x13   : > { %s314_s28 = sshll.u32 (!%p171_p10), %s199_s27, 4  ;;  %s690_s28 = int_to_ptr.vmem [resolvable:$true] %s314_s28 }
  0x14   : > { %s504_s6 = scalar_lea.vmem (!%p171_p10), %s690_s28, 128 }
  0x15   : > { %445 = vmatpush3.bf16.msra.mxu0 (!%p171_p10), %v444_v7  ;;  %p505_p12 = scmp.ne.s32.totalorder (!%p171_p10), %s690_s28, %s504_s6 }
  0x16   : > { %s201_s7 = scalar_select %p200_p11, %s574_s15, 1 }
  0x17   : > { %p506_p13 = pnand %p505_p12, %p648_p4  ;;  %s587_s15 = smov [#allocation2]  }
  0x18   : > { %s417_s8 = sshll.u32 %s201_s7, 3  ;;  %s508_s7 = sshll.u32 %s587_s15, 4  ;;  %s509_s7 = int_to_ptr.vmem [resolvable:$false] %s508_s7 }
  0x19   : > { %s203_s11 = scalar_lea.vmem %s735_s0, %s417_s8  ;;  %p507_p0 = pneg %p506_p13 }
  0x1a   : > { %v211_v8 = vld [vmem:[%s203_s11] sm:$0xff]  ;;  %s510_s8 = scalar_lea.vmem %s509_s7, 256  ;;  %p511_p1 = scmp.lt.s32.totalorder %s690_s28, %s509_s7 }
  0x1b   : > { %438 = vmatmul.mubr.msk.f32.vlgmr.msra.gmra.mrb[0].mxu0 %vm223_vm1, %v211_v8  ;;  %p512_p2 = scmp.lt.s32.totalorder %s510_s8, %s504_s6 }
  0x1d   : > { %p513_p3 = por %p512_p2, %p511_p1 }
  0x1f   : > { %p514_p5 = pnand %p513_p3, %p507_p0 }
  0xee   : > { %v293_v10 = vpop.f32.mrb[0].mxu0 }
  0xef   : > { %v294_v11 = vadd.f32 %v418_v9, %v293_v10  ;;  %v439_v12 = vpop.f32.mrb[1].mxu0 }
  0xf1   : > { %298 = vst.msk [vmem:[%s199_s27] sm:$0xff] %vm297_vm2, %v294_v11 }
  0xf2   : > { %517 = shalt.err (!%p514_p5)
}
  0xf3   : > { %s518_s9 = scalar_lea.hbm %s688_s4, 128  ;;  %s522_s18 = scalar_lea.hbm %s738_s3, 256 }
  0xf4   : > { %p519_p6 = scmp.ne.s32.totalorder %s688_s4, %s518_s9  ;;  %p523_p10 = scmp.lt.u32.totalorder %s688_s4, %s738_s3 }
  0xf5   : > { %p524_p11 = scmp.lt.u32.totalorder %s522_s18, %s518_s9  ;;  %p526_p13 = scmp.lt.u32.totalorder %s518_s9, %s688_s4 }
  0xf6   : > { %p520_p7 = pnand %p519_p6, %p648_p4 }
  0xf7   : > { %p525_p12 = por %p524_p11, %p523_p10 }
  0xf8   : > { %p521_p9 = pneg %p520_p7 }
  0xf9   : > { %p527_p0 = por %p526_p13, %p525_p12 }
  0xfb   : > { %p528_p1 = pnand %p527_p0, %p521_p9 }
  0xfd   : > { %531 = shalt.err (!%p528_p1)
}
  0xfe   : > { %446 = dma.vmem_to_hbm [thread:$0]  (%p648_p4), %s690_s28, 128, %s688_s4, %s300_s5  }
  0xff PF: > { %p452_p2 = scmp.ge.s32.totalorder %s582_s17, 2  ;;  %s326_s23 = sand.u32 1, %s562_s12  }
 0x100   : > { %s327_s26 = scalar_lea.sflag [#allocation3], %s326_s23 }
 0x101   : > { %p449_p3 = pnand %p452_p2, %p655_p8 }
 0x103   : > { %557 = dma.done.wait (!%p449_p3), %s327_s26, 128  }
 0x104   : > { %559 = vsyncadd (!%p449_p3), %s327_s26, 4294967168  ;;  %s16_s17 = sadd.s32 1, %s582_s17   ;;  %s741_s12 = smov %s566_s13 }
 0x105   : > { %p13_p5 = scmp.ge.s32.totalorder %s16_s17, 4   ;;  %s742_s13 = smov %s570_s14 }
 0x106   : > { %s743_s14 = smov %s661_s25  ;;  %s744_s15 = smov %s578_s16 }
 0x107   : > { %s745_s16 = smov %s747_s20  ;;  %15 = sbr.rel (!%p13_p5) target bundleno = 4 (0x4), region = 73 }
 0x10e   :  { %332 = vsyncpa [#allocation3], 1 }
 0x10f   :  { %334 = vsyncpa [#allocation3 + $0x1], 1 }

// kernel: _lambda_.12
= control target key start
LH: loop header
LB: loop body
LE: loop exit
PB: predicated region body
PF: predicated region fallthrough
CT: control target
= control target key end

     0   :  { %s881_s24 = smov 0   ;;  %s883_s25 = smov 0   ;;  %s999_s0 = inlined_call_operand.vmem [shape: f32[16,32], index: 0, kind: input, shape index: {}]   ;;  %s1000_s1 = inlined_call_operand.vmem [shape: f32[32,128], index: 1, kind: input, shape index: {}]   ;;  %s1001_s2 = inlined_call_operand.vmem [shape: f32[1,128], index: 2, kind: input, shape index: {}]   ;;  %s1002_s3 = inlined_call_operand.vmem [shape: f32[128,32], index: 3, kind: input, shape index: {}]   ;;  %s1003_s4 = inlined_call_operand.vmem [shape: f32[1,32], index: 4, kind: input, shape index: {}]   ;;  %s1004_s5 = inlined_call_operand.vmem [shape: f32[1,32], index: 5, kind: input, shape index: {}]   ;;  %s1005_s6 = inlined_call_operand.vmem [shape: f32[1,32], index: 6, kind: input, shape index: {}]   ;;  %s1006_s7 = inlined_call_operand.vmem [shape: f32[16,32], index: 7, kind: output, shape index: {}]  }
   0x1   :  { %s885_s26 = smov 0  }
   0x2 LB: > { %s29_s27 = sadd.s32 1, %s832_s25  ;;  %p677_p0 = scmp.ge.s32.totalorder %s836_s26, 1  ;;  %s836_s26 = sphi %s885_s26, %s17_s26   ;;  %s832_s25 = sphi %s883_s25, %s1008_s25   ;;  %s828_s24 = sphi %s881_s24, %s1007_s24  }
   0x3   : > { %p31_p1 = scmp.ge.s32.totalorder %s29_s27, 2  ;;  %p276_p2 = scmp.lt.s32.totalorder %s836_s26, 3 }
   0x5   : > { %s1010_s27 = smov (%p31_p1, %s29_s27), 0  ;;  %p277_p3 = pnand %p677_p0, %p276_p2 }
   0x6   : > { %v346_v0 = vld [vmem:[%s1000_s1] sm:$0xff] (!%p277_p3)  ;;  %v347_v1 = vld [vmem:[%s1000_s1 + $0x8] sm:$0xff] (!%p277_p3)  ;;  %v348_v2 = vld [vmem:[%s1000_s1 + $0x10] sm:$0xff] (!%p277_p3)  ;;  %p318_p4 = scmp.lt.s32.totalorder (!%p277_p3), %s828_s24, 1  ;;  %v838_v3 = vmov (!%p277_p3), 0.0|0.0   ;;  %vm839_vm0 = vmmov (!%p277_p3), 0  }
   0x7   : > { %280 = sbr.rel (%p277_p3) target bundleno = 774 (0x306), region = 48  ;;  %755 = vmatprep.subr.bf16.mxu0 (!%p277_p3), %v838_v3  ;;  %v756_v4 = vpack.c.bf16 (!%p277_p3), %v347_v1, %v346_v0  ;;  %v349_v5 = vld [vmem:[%s1000_s1 + $0x18] sm:$0xff] (!%p277_p3)  ;;  %761 = vmatprep.subr.bf16.mxu1 (!%p277_p3), %v838_v3  ;;  %v433_v6 = vld [vmem:[%s1002_s3] sm:$0xff] (!%p277_p3)  ;;  %v434_v7 = vld [vmem:[%s1002_s3 + $0x8] sm:$0xff] (!%p277_p3)  ;;  %v840_v8 = vmov (!%p277_p3), 0.0   ;;  %vm343_vm1 = vcmask (!%p277_p3), 261120  }
   0x8   : > { %717 = vmatprep.mubr.msk.f32.mxu0 (!%p277_p3), %vm839_vm0, %v840_v8  ;;  %v762_v9 = vpack.c.bf16 (!%p277_p3), %v434_v7, %v433_v6  ;;  %v435_v10 = vld [vmem:[%s1002_s3 + $0x10] sm:$0xff] (!%p277_p3)  ;;  %v436_v11 = vld [vmem:[%s1002_s3 + $0x18] sm:$0xff] (!%p277_p3)  ;;  %752 = vmatprep.mubr.msk.f32.mxu1 (!%p277_p3), %vm839_vm0, %v840_v8  ;;  %v759_v12 = vpack.c.bf16 (!%p277_p3), %v349_v5, %v348_v2  ;;  %v437_v14 = vld [vmem:[%s1002_s3 + $0x20] sm:$0xff] (!%p277_p3) }
   0x9   : > { %757 = vmatpush3.bf16.msra.mxu0 (!%p277_p3), %v756_v4  ;;  %v765_v13 = vpack.c.bf16 (!%p277_p3), %v436_v11, %v435_v10  ;;  %v438_v15 = vld [vmem:[%s1002_s3 + $0x28] sm:$0xff] (!%p277_p3)  ;;  %v439_v18 = vld [vmem:[%s1002_s3 + $0x30] sm:$0xff] (!%p277_p3)  ;;  %v440_v19 = vld [vmem:[%s1002_s3 + $0x38] sm:$0xff] (!%p277_p3) }
   0xa   : > { %758 = vmatprep.subr.bf16.mxu0 (!%p277_p3), %v838_v3  ;;  %763 = vmatpush3.bf16.msra.mxu1 (!%p277_p3), %v762_v9  ;;  %v768_v17 = vpack.c.bf16 (!%p277_p3), %v438_v15, %v437_v14  ;;  %v771_v20 = vpack.c.bf16 (!%p277_p3), %v440_v19, %v439_v18  ;;  %v441_v21 = vld [vmem:[%s1002_s3 + $0x40] sm:$0xff] (!%p277_p3)  ;;  %v442_v22 = vld [vmem:[%s1002_s3 + $0x48] sm:$0xff] (!%p277_p3)  ;;  %v443_v24 = vld [vmem:[%s1002_s3 + $0x50] sm:$0xff] (!%p277_p3) }
   0xb   : > { %764 = vmatprep.subr.bf16.mxu1 (!%p277_p3), %v838_v3  ;;  %v774_v23 = vpack.c.bf16 (!%p277_p3), %v442_v22, %v441_v21  ;;  %v444_v25 = vld [vmem:[%s1002_s3 + $0x58] sm:$0xff] (!%p277_p3)  ;;  %v445_v27 = vld [vmem:[%s1002_s3 + $0x60] sm:$0xff] (!%p277_p3)  ;;  %v446_v28 = vld [vmem:[%s1002_s3 + $0x68] sm:$0xff] (!%p277_p3) }
   0xc   : > { %v777_v26 = vpack.c.bf16 (!%p277_p3), %v444_v25, %v443_v24  ;;  %v780_v29 = vpack.c.bf16 (!%p277_p3), %v446_v28, %v445_v27  ;;  %v447_v30 = vld [vmem:[%s1002_s3 + $0x70] sm:$0xff] (!%p277_p3)  ;;  %v448_v31 = vld [vmem:[%s1002_s3 + $0x78] sm:$0xff] (!%p277_p3)  ;;  %v680_v33 = vld [vmem:[%s1001_s2] ss:$0 sm:$0xff] (!%p277_p3) }
   0xd   : > { %760 = vmatpush3.bf16.msra.mxu0 (!%p277_p3), %v759_v12  ;;  %v783_v32 = vpack.c.bf16 (!%p277_p3), %v448_v31, %v447_v30  ;;  %v682_v42 = vld [vmem:[%s1003_s4] ss:$0 sm:$0xff] (!%p277_p3) }
   0xe   : > { %s1012_s24 = smov (!%p318_p4, %s828_s24), 1  ;;  %766 = vmatpush3.bf16.msra.mxu1 %v765_v13  ;;  %v683_v56 = vld [vmem:[%s1004_s5] ss:$0 sm:$0xff] }
   0xf   : > { %s678_s21 = sshll.u32 %s1012_s24, 3  ;;  %767 = vmatprep.subr.bf16.mxu1 %v838_v3  ;;  %v684_v58 = vld [vmem:[%s1005_s6] ss:$0 sm:$0xff] }
  0x10   : > { %s926_s28 = scalar_lea.vmem %s1006_s7, %s678_s21  ;;  %s321_s8 = scalar_lea.vmem %s999_s0, %s678_s21 }
  0x11   : > { %344 = vst.msk [vmem:[%s926_s28] sm:$0xff] %vm343_vm1, %v840_v8  ;;  %v345_v16 = vld [vmem:[%s321_s8] sm:$0xff] }
  0x12   : > { %718 = vmatmul.mubr.msk.f32.vlgmr.msra.gmra.mrb[0].mxu0 %vm343_vm1, %v345_v16  ;;  %769 = vmatpush3.bf16.msra.mxu1 %v768_v17 }
  0x13   : > { %770 = vmatprep.subr.bf16.mxu1 %v838_v3 }
  0x16   : > { %772 = vmatpush3.bf16.msra.mxu1 %v771_v20 }
  0x17   : > { %773 = vmatprep.subr.bf16.mxu1 %v838_v3 }
  0x18   : > { %v432_v38 = vld [vmem:[%s926_s28] sm:$0xff] }
  0x1a   : > { %775 = vmatpush3.bf16.msra.mxu1 %v774_v23 }
  0x1b   : > { %776 = vmatprep.subr.bf16.mxu1 %v838_v3 }
  0x1e   : > { %778 = vmatpush3.bf16.msra.mxu1 %v777_v26 }
  0x1f   : > { %779 = vmatprep.subr.bf16.mxu1 %v838_v3 }
  0x22   : > { %781 = vmatpush3.bf16.msra.mxu1 %v780_v29 }
  0x23   : > { %782 = vmatprep.subr.bf16.mxu1 %v838_v3 }
  0x26   : > { %784 = vmatpush3.bf16.msra.mxu1 %v783_v32 }
  0xe5   : > { %v427_v34 = vpop.f32.mrb[0].mxu0 }
  0xe6   : > { %v428_v35 = vadd.f32 %v680_v33, %v427_v34  ;;  %v719_v36 = vpop.f32.mrb[1].mxu0 }
  0xe8   : > { %v431_v37 = vmax.f32 %v428_v35, 0.0 }
  0xea   : > { %753 = vmatmul.mubr.f32.vlgmr.msra.gmra.mrb[0].mxu1 %v431_v37 }
 0x1bd   : > { %v515_v39 = vpop.f32.mrb[0].mxu1 }
 0x1be   : > { %v519_v40 = vadd.f32 %v515_v39, %v432_v38  ;;  %v754_v41 = vpop.f32.mrb[1].mxu1 }
 0x1c0   : > { %520 = vst.msk [vmem:[%s926_s28] sm:$0xff] %vm343_vm1, %v519_v40 }
 0x1c7   : > { %v524_v43 = vld [vmem:[%s926_s28] sm:$0xff] }
 0x1c8   : > { %v532_v44 = vadd.f32 %v682_v42, %v524_v43 }
 0x1ca   : > { %v534_v45 = vadd.f32 %v532_v44, %v345_v16 }
 0x1cc   : > { %v537_v46 = vsel %vm343_vm1, %v534_v45, 0.0 }
 0x1cd   : > { %538 = vadd.xlane.f32.xlu0 %v537_v46 }
 0x25a   : > { %v539_v47 = vpop.xlane.xlu0 %538 }
 0x25b   : > { %v541_v48 = vmul.f32 0.03125, %v539_v47 }
 0x25d   : > { %v542_v49 = vsub.f32 %v534_v45, %v541_v48 }
 0x25f   : > { %v543_v50 = vmul.f32 %v542_v49, %v542_v49 }
 0x261   : > { %v544_v51 = vsel %vm343_vm1, %v543_v50, 0.0 }
 0x262   : > { %545 = vadd.xlane.f32.xlu0 %v544_v51 }
 0x2ef   : > { %v546_v52 = vpop.xlane.xlu0 %545 }
 0x2f0   : > { %v547_v53 = vmul.f32 0.03125, %v546_v52 }
 0x2f2   : > { %v548_v54 = vadd.f32 1e-05, %v547_v53 }
 0x2f4   : > { %812 = vrsqrt.f32 %v548_v54 }
 0x2fe   : > { %v813_v55 = vpop.eup %812 }
 0x2ff   : > { %v550_v57 = vmul.f32 %v813_v55, %v542_v49 }
 0x301   : > { %v557_v59 = vmul.f32 %v683_v56, %v550_v57 }
 0x303   : > { %v564_v60 = vadd.f32 %v684_v58, %v557_v59 }
 0x305   : > { %565 = vst.msk [vmem:[%s926_s28] sm:$0xff] %vm343_vm1, %v564_v60 }
 0x306 PF: > { %s17_s26 = sadd.s32 1, %s836_s26   ;;  %s1007_s24 = smov %s832_s25 }
 0x307   : > { %p14_p5 = scmp.ge.s32.totalorder %s17_s26, 4   ;;  %s1008_s25 = smov %s1010_s27 }
 0x309   :  { %16 = sbr.rel (!%p14_p5) target bundleno = 2 (0x2), region = 95 }

// kernel: _lambda_.11
= control target key start
LH: loop header
LB: loop body
LE: loop exit
PB: predicated region body
PF: predicated region fallthrough
CT: control target
= control target key end

     0   :  { %s1659_s30 = smov 0   ;;  %s1817_s0 = inlined_call_operand.vmem [shape: f32[2,1,8], index: 0, kind: input, shape index: {}]   ;;  %s1818_s1 = inlined_call_operand.vmem [shape: f32[2,8,32], index: 1, kind: input, shape index: {}, may-alias: {1,2}]   ;;  %s1819_s2 = inlined_call_operand.vmem [shape: f32[2,8,32], index: 2, kind: input, shape index: {}, may-alias: {1,2}]   ;;  %s1820_s3 = inlined_call_operand.vmem [shape: f32[32,32], index: 3, kind: input, shape index: {}]   ;;  %s1821_s4 = inlined_call_operand.vmem [shape: f32[32,64], index: 4, kind: input, shape index: {}]   ;;  %s1822_s5 = inlined_call_operand.vmem [shape: f32[32,32], index: 5, kind: input, shape index: {}]   ;;  %s1823_s6 = inlined_call_operand.vmem [shape: f32[1,32], index: 6, kind: input, shape index: {}]   ;;  %s1824_s7 = inlined_call_operand.vmem [shape: f32[1,32], index: 7, kind: input, shape index: {}]   ;;  %s1825_s8 = inlined_call_operand.vmem [shape: f32[1,32], index: 8, kind: input, shape index: {}]   ;;  %s1826_s9 = inlined_call_operand.vmem [shape: f32[2,8,32], index: 9, kind: output, shape index: {}]  }
   0x1 LB: > { %s1398_s10 = sadd.s32 4294967295, %s1594_s30   ;;  %p1402_p0 = scmp.ge.s32.totalorder %s1594_s30, 1  ;;  %s1594_s30 = sphi %s1659_s30, %s19_s30  }
   0x2   : > { %p303_p1 = scmp.lt.s32.totalorder %s1594_s30, 3 }
   0x4   : > { %p304_p2 = pnand %p1402_p0, %p303_p1 }
   0x5   : > { %v439_v0 = vld [vmem:[%s1821_s4] sm:$0xff] (!%p304_p2)  ;;  %v440_v1 = vld [vmem:[%s1821_s4 + $0x8] sm:$0xff] (!%p304_p2)  ;;  %v1596_v3 = vmov (!%p304_p2), 0.0|0.0   ;;  %v441_v6 = vld [vmem:[%s1821_s4 + $0x10] sm:$0xff] (!%p304_p2)  ;;  %p344_p3 = scmp.lt.s32.totalorder (!%p304_p2), %s1398_s10, 1  ;;  %vm1597_vm0 = vmmov (!%p304_p2), 0  }
   0x6   : > { %307 = sbr.rel (%p304_p2) target bundleno = 1744 (0x6d0), region = 56  ;;  %v361_v2 = vld [vmem:[%s1820_s3] sm:$0xff] (!%p304_p2)  ;;  %1537 = vmatprep.subr.bf16.mxu1 (!%p304_p2), %v1596_v3  ;;  %v1538_v4 = vpack.c.bf16 (!%p304_p2), %v440_v1, %v439_v0  ;;  %1531 = vmatprep.subr.bf16.mxu0 (!%p304_p2), %v1596_v3  ;;  %v362_v5 = vld [vmem:[%s1820_s3 + $0x8] sm:$0xff] (!%p304_p2)  ;;  %v442_v7 = vld [vmem:[%s1821_s4 + $0x18] sm:$0xff] (!%p304_p2)  ;;  %v1598_v9 = vmov (!%p304_p2), 0.0   ;;  %vm365_vm1 = vcmask (!%p304_p2), 261120  }
   0x7   : > { %v1532_v8 = vpack.c.bf16 (!%p304_p2), %v362_v5, %v361_v2  ;;  %1477 = vmatprep.mubr.msk.f32.mxu1 (!%p304_p2), %vm1597_vm0, %v1598_v9  ;;  %v363_v10 = vld [vmem:[%s1820_s3 + $0x10] sm:$0xff] (!%p304_p2)  ;;  %v364_v11 = vld [vmem:[%s1820_s3 + $0x18] sm:$0xff] (!%p304_p2)  ;;  %1466 = vmatprep.mubr.msk.f32.mxu0 (!%p304_p2), %vm1597_vm0, %v1598_v9  ;;  %v1541_v12 = vpack.c.bf16 (!%p304_p2), %v442_v7, %v441_v6  ;;  %vm524_vm2 = vcmask (!%p304_p2), 64512   ;;  %s1599_s15 = smov (!%p304_p2), 112   ;;  %s1600_s16 = smov (!%p304_p2), 120   ;;  %vm1204_vm4 = vcmask (!%p304_p2), 130048  }
   0x8   : > { %1539 = vmatpush3.bf16.msra.mxu1 (!%p304_p2), %v1538_v4  ;;  %v1535_v13 = vpack.c.bf16 (!%p304_p2), %v364_v11, %v363_v10  ;;  %s1601_s17 = smov (!%p304_p2), 104   ;;  %s1603_s21 = smov (!%p304_p2), 80   ;;  %vm1206_vm5 = vcmask (!%p304_p2), 195584  }
   0x9   : > { %1533 = vmatpush3.bf16.msra.mxu0 (!%p304_p2), %v1532_v8  ;;  %1540 = vmatprep.subr.bf16.mxu1 (!%p304_p2), %v1596_v3  ;;  %s1604_s22 = smov (!%p304_p2), 72   ;;  %s1605_s23 = smov (!%p304_p2), 88  }
   0xa   : > { %1534 = vmatprep.subr.bf16.mxu0 (!%p304_p2), %v1596_v3 }
   0xc   : > { %1542 = vmatpush3.bf16.msra.mxu1 (!%p304_p2), %v1541_v12 }
   0xd   : > { %s1828_s10 = smov (!%p344_p3, %s1398_s10), 1  ;;  %1536 = vmatpush3.bf16.msra.mxu0 %v1535_v13  ;;  %1480 = vmatprep.subr.mxu1 %v1598_v9 }
   0xe   : > { %s1702_s27 = sshll.u32 %s1828_s10, 3  ;;  %1490 = vmatprep.subr.mxu0 %v1598_v9  ;;  %s346_s20 = scalar_lea.vmem %s1817_s0, %s1828_s10 }
   0xf   : > { %s350_s11 = scalar_lea.vmem %s1818_s1, %s1702_s27  ;;  %s354_s14 = scalar_lea.vmem %s1819_s2, %s1702_s27  ;;  %v1408_v26 = vld [vmem:[%s346_s20] ss:$0 sm:$0xff] }
  0x10   : > { %v360_v14 = vld [vmem:[%s350_s11] sm:$0xff]  ;;  %vm523_vm3 = vcmp.gt.f32.partialorder %v1408_v26, 0.0  ;;  %s1602_s10 = smov 96   ;;  %s358_s24 = scalar_lea.vmem %s1826_s9, %s1702_s27 }
  0x11   : > { %v1712_v15 = vld [vmem:[%s354_s14] sm:$0xff]  ;;  %1478 = vmatmul.mubr.msk.f32.vlgmr.msra.gmra.mrb[0].mxu1 %vm365_vm1, %v360_v14  ;;  %s1606_s14 = smov 8  }
  0x12   : > { %1467 = vmatmul.mubr.msk.f32.vlgmr.msra.gmra.mrb[0].mxu0 %vm365_vm1, %v1712_v15  ;;  %1482 = vmatprep.mubr.msk.f32.mxu1 %vm1597_vm0, %v1598_v9 }
  0x13   : > { %1492 = vmatprep.mubr.msk.f32.mxu0 %vm1597_vm0, %v1598_v9 }
  0xe4   : > { %v1723_v16 = vpop.f32.mrb[0].mxu1 }
  0xe5   : > { %859 = vrot.lane.b32.xlu1 %v1723_v16, %s1599_s15  ;;  %692 = vrot.lane.b32.xlu0 %v1723_v16, %s1600_s16  ;;  %v1479_v17 = vpop.f32.mrb[1].mxu1  ;;  %v435_v18 = vpop.f32.mrb[0].mxu0 }
  0xe6   : > { %1481 = vmatpush3.xpose.msk.msra.mxu1 %vm524_vm2, %v1723_v16  ;;  %v1468_v19 = vpop.f32.mrb[1].mxu0 }
  0xe7   : > { %1485 = vmatprep.subr.mxu1 %v1598_v9 }
  0xe9   : > { %1483 = vmatmul.mubr.msk.f32.vlgmr.msra.gmra.mrb[2].mxu1 %vm524_vm2, %v435_v18  ;;  %857 = vrot.lane.b32.xlu1 %v435_v18, %s1599_s15  ;;  %s1607_s15 = smov 16  }
  0xea   : > { %690 = vrot.lane.b32.xlu0 %v435_v18, %s1600_s16  ;;  %1487 = vmatprep.mubr.msk.f32.mxu1 %vm1597_vm0, %v1598_v9  ;;  %s1608_s16 = smov 24  }
  0xed   : > { %1024 = vrot.lane.b32.xlu1 %v435_v18, %s1601_s17 }
  0xee   : > { %1026 = vrot.lane.b32.xlu0 %v1723_v16, %s1601_s17 }
 0x157   : > { %v693_v20 = vpop.permute.xlu0 %692  ;;  %v860_v21 = vpop.permute.xlu1 %859 }
 0x158   : > { %1491 = vmatpush3.xpose.msk.msra.mxu0 %vm524_vm2, %v693_v20 }
 0x159   : > { %1500 = vmatprep.subr.mxu0 %v1598_v9 }
 0x15b   : > { %v858_v23 = vpop.permute.xlu1 %857 }
 0x15c   : > { %v691_v22 = vpop.permute.xlu0 %690 }
 0x15d   : > { %1493 = vmatmul.mubr.msk.f32.vlgmr.msra.gmra.mrb[2].mxu0 %vm524_vm2, %v691_v22 }
 0x15e   : > { %1501 = vmatpush3.xpose.msk.msra.mxu0 %vm524_vm2, %v860_v21  ;;  %1502 = vmatprep.mubr.msk.f32.mxu0 %vm1597_vm0, %v1598_v9 }
 0x15f   : > { %1510 = vmatprep.subr.mxu0 %v1598_v9  ;;  %v1025_v25 = vpop.permute.xlu1 %1024 }
 0x160   : > { %v1027_v24 = vpop.permute.xlu0 %1026 }
 0x161   : > { %1503 = vmatmul.mubr.msk.f32.vlgmr.msra.gmra.mrb[4].mxu0 %vm524_vm2, %v858_v23 }
 0x162   : > { %1511 = vmatpush3.xpose.msk.msra.mxu0 %vm524_vm2, %v1027_v24  ;;  %1512 = vmatprep.mubr.msk.f32.mxu0 %vm1597_vm0, %v1598_v9  ;;  %v1208_v24 = vld [vmem:[%s1822_s5] sm:$0xff] }
 0x163   : > { %1543 = vmatprep.subr.bf16.mxu0 %v1596_v3 }
 0x165   : > { %1513 = vmatmul.mubr.msk.f32.vlgmr.msra.gmra.mrb[6].mxu0 %vm524_vm2, %v1025_v25  ;;  %v1209_v25 = vld [vmem:[%s1822_s5 + $0x8] sm:$0xff] }
 0x166   : > { %1528 = vmatprep.mubr.msk.f32.mxu0 %vm1597_vm0, %v1598_v9  ;;  %v1544_v26 = vpack.c.bf16 %v1209_v25, %v1208_v24 }
 0x168   : > { %1545 = vmatpush3.bf16.msra.mxu0 %v1544_v26 }
 0x169   : > { %1546 = vmatprep.subr.bf16.mxu0 %v1596_v3 }
 0x1bc   : > { %v597_v27 = vpop.f32.mrb[2].mxu1 }
 0x1bd   : > { %v601_v28 = vsel %vm523_vm3, %v597_v27, -1e+20  ;;  %v1484_v29 = vpop.f32.mrb[3].mxu1  ;;  %v1211_v27 = vld [vmem:[%s1822_s5 + $0x18] sm:$0xff] }
 0x1be   : > { %v602_v30 = vmul.f32 0.17677669, %v601_v28 }
 0x1c0   : > { %v603_v31 = vsel %vm524_vm2, %v602_v30, -inf }
 0x1c1   : > { %604 = vmax.xlane.f32.xlu0 %v603_v31 }
 0x230   : > { %v764_v32 = vpop.f32.mrb[2].mxu0 }
 0x231   : > { %v768_v33 = vsel %vm523_vm3, %v764_v32, -1e+20  ;;  %v1494_v34 = vpop.f32.mrb[3].mxu0 }
 0x232   : > { %v769_v35 = vmul.f32 0.17677669, %v768_v33 }
 0x234   : > { %v931_v36 = vpop.f32.mrb[4].mxu0  ;;  %v770_v37 = vsel %vm524_vm2, %v769_v35, -inf }
 0x235   : > { %v935_v38 = vsel %vm523_vm3, %v931_v36, -1e+20  ;;  %v1504_v39 = vpop.f32.mrb[5].mxu0  ;;  %771 = vmax.xlane.f32.xlu1 %v770_v37 }
 0x236   : > { %v936_v40 = vmul.f32 0.17677669, %v935_v38 }
 0x238   : > { %v1098_v41 = vpop.f32.mrb[6].mxu0  ;;  %v937_v42 = vsel %vm524_vm2, %v936_v40, -inf }
 0x239   : > { %v1102_v43 = vsel %vm523_vm3, %v1098_v41, -1e+20  ;;  %v1514_v44 = vpop.f32.mrb[7].mxu0  ;;  %938 = vmax.xlane.f32.xlu0 %v937_v42 }
 0x23a   : > { %v1103_v45 = vmul.f32 0.17677669, %v1102_v43 }
 0x23c   : > { %v1104_v46 = vsel %vm524_vm2, %v1103_v45, -inf }
 0x23d   : > { %1105 = vmax.xlane.f32.xlu0 %v1104_v46 }
 0x246   : > { %614 = vrot.lane.b32.xlu1 %v1723_v16, %s1602_s10 }
 0x24e   : > { %v605_v47 = vpop.xlane.xlu0 %604 }
 0x24f   : > { %v606_v48 = vsub.f32 %v602_v30, %v605_v47 }
 0x251   : > { %v607_v49 = vmul.f32 1.442695, %v606_v48 }
 0x253   : > { %1570 = vpow2.f32 %v607_v49 }
 0x25d   : > { %v1571_v50 = vpop.eup %1570 }
 0x25e   : > { %v609_v51 = vsel %vm524_vm2, %v1571_v50, 0.0 }
 0x26a   : > { %610 = vadd.xlane.f32.xlu1 %v609_v51 }
 0x2c2   : > { %v772_v52 = vpop.xlane.xlu1 %771 }
 0x2c3   : > { %v773_v53 = vsub.f32 %v769_v35, %v772_v52 }
 0x2c5   : > { %v774_v54 = vmul.f32 1.442695, %v773_v53 }
 0x2c6   : > { %v615_v55 = vpop.permute.xlu1 %614  ;;  %v939_v56 = vpop.xlane.xlu0 %938 }
 0x2c7   : > { %1572 = vpow2.f32 %v774_v54  ;;  %v940_v57 = vsub.f32 %v936_v40, %v939_v56  ;;  %1486 = vmatpush3.msra.mxu1 %v615_v55  ;;  %v1421_v40 = vld [vmem:[%s1823_s6] ss:$0 sm:$0xff] }
 0x2c8   : > { %1495 = vmatprep.subr.mxu1 %v1598_v9  ;;  %v1424_v56 = vld [vmem:[%s1825_s8] ss:$0 sm:$0xff] }
 0x2c9   : > { %v941_v58 = vmul.f32 1.442695, %v940_v57 }
 0x2ca   : > { %v1106_v59 = vpop.xlane.xlu0 %1105 }
 0x2cb   : > { %1574 = vpow2.f32 %v941_v58  ;;  %v1107_v60 = vsub.f32 %v1103_v45, %v1106_v59 }
 0x2cd   : > { %v1108_v61 = vmul.f32 1.442695, %v1107_v60 }
 0x2cf   : > { %1576 = vpow2.f32 %v1108_v61 }
 0x2d1   : > { %v1573_v62 = vpop.eup %1572 }
 0x2d2   : > { %v776_v63 = vsel %vm524_vm2, %v1573_v62, 0.0 }
 0x2d3   : > { %777 = vadd.xlane.f32.xlu0 %v776_v63 }
 0x2d5   : > { %v1575_v0 = vpop.eup %1574 }
 0x2d6   : > { %v943_v1 = vsel %vm524_vm2, %v1575_v0, 0.0 }
 0x2d7   : > { %944 = vadd.xlane.f32.xlu1 %v943_v1 }
 0x2d9   : > { %v1577_v2 = vpop.eup %1576 }
 0x2da   : > { %v1110_v4 = vsel %vm524_vm2, %v1577_v2, 0.0 }
 0x2db   : > { %1111 = vadd.xlane.f32.xlu0 %v1110_v4 }
 0x2e8   : > { %948 = vrot.lane.b32.xlu1 %v1723_v16, %s1603_s21 }
 0x2ec   : > { %1115 = vrot.lane.b32.xlu1 %v1723_v16, %s1604_s22 }
 0x2f1   : > { %781 = vrot.lane.b32.xlu0 %v1723_v16, %s1605_s23 }
 0x2f7   : > { %v611_v5 = vpop.xlane.xlu1 %610 }
 0x2f8   : > { %1578 = vrcp.f32 %v611_v5 }
 0x302   : > { %v1579_v6 = vpop.eup %1578 }
 0x303   : > { %v613_v7 = vmul.f32 %v1579_v6, %v1571_v50 }
 0x305   : > { %1488 = vmatmul.mubr.msk.f32.vlgmr.msra.gmra.mrb[4].mxu1 %vm524_vm2, %v613_v7 }
 0x306   : > { %1497 = vmatprep.mubr.msk.f32.mxu1 %vm1597_vm0, %v1598_v9 }
 0x360   : > { %v778_v8 = vpop.xlane.xlu0 %777 }
 0x361   : > { %1580 = vrcp.f32 %v778_v8 }
 0x364   : > { %v945_v10 = vpop.xlane.xlu1 %944 }
 0x365   : > { %1582 = vrcp.f32 %v945_v10 }
 0x368   : > { %v1112_v11 = vpop.xlane.xlu0 %1111  ;;  %v949_v14 = vpop.permute.xlu1 %948 }
 0x369   : > { %1584 = vrcp.f32 %v1112_v11 }
 0x36b   : > { %v1581_v12 = vpop.eup %1580 }
 0x36c   : > { %v780_v13 = vmul.f32 %v1581_v12, %v1573_v62  ;;  %v782_v17 = vpop.permute.xlu0 %781  ;;  %v1116_v19 = vpop.permute.xlu1 %1115 }
 0x36d   : > { %1496 = vmatpush3.msra.mxu1 %v782_v17 }
 0x36e   : > { %1498 = vmatmul.mubr.msk.f32.vlgmr.msra.gmra.mrb[6].mxu1 %vm524_vm2, %v780_v13  ;;  %1505 = vmatprep.subr.mxu1 %v1598_v9 }
 0x36f   : > { %v1583_v16 = vpop.eup %1582  ;;  %1506 = vmatpush3.msra.mxu1 %v949_v14  ;;  %1507 = vmatprep.mubr.msk.f32.mxu1 %vm1597_vm0, %v1598_v9 }
 0x370   : > { %v947_v18 = vmul.f32 %v1583_v16, %v1575_v0  ;;  %1515 = vmatprep.subr.mxu1 %v1598_v9 }
 0x372   : > { %1508 = vmatmul.mubr.msk.f32.vlgmr.msra.gmra.mrb[8].mxu1 %vm524_vm2, %v947_v18 }
 0x373   : > { %v1585_v20 = vpop.eup %1584  ;;  %1516 = vmatpush3.msra.mxu1 %v1116_v19  ;;  %1517 = vmatprep.mubr.msk.f32.mxu1 %vm1597_vm0, %v1598_v9  ;;  %v1210_v9 = vld [vmem:[%s1822_s5 + $0x10] sm:$0xff] }
 0x374   : > { %v1114_v21 = vmul.f32 %v1585_v20, %v1577_v2  ;;  %v1547_v28 = vpack.c.bf16 %v1211_v27, %v1210_v9 }
 0x376   : > { %1518 = vmatmul.mubr.msk.f32.vlgmr.msra.gmra.mrb[10].mxu1 %vm524_vm2, %v1114_v21  ;;  %1548 = vmatpush3.bf16.msra.mxu0 %v1547_v28 }
 0x3d8   : > { %v686_v22 = vpop.f32.mrb[4].mxu1 }
 0x3d9   : > { %v1489_v23 = vpop.f32.mrb[5].mxu1 }
 0x441   : > { %v853_v29 = vpop.f32.mrb[6].mxu1 }
 0x442   : > { %1192 = vrot.lane.b32.xlu0 %v853_v29, %s1606_s14  ;;  %v1499_v30 = vpop.f32.mrb[7].mxu1 }
 0x445   : > { %v1020_v31 = vpop.f32.mrb[8].mxu1 }
 0x446   : > { %1196 = vrot.lane.b32.xlu1 %v1020_v31, %s1607_s15  ;;  %v1509_v32 = vpop.f32.mrb[9].mxu1 }
 0x449   : > { %v1187_v33 = vpop.f32.mrb[10].mxu1 }
 0x44a   : > { %1200 = vrot.lane.b32.xlu0 %v1187_v33, %s1608_s16  ;;  %v1519_v3 = vpop.f32.mrb[11].mxu1 }
 0x4b4   : > { %v1193_v34 = vpop.permute.xlu0 %1192 }
 0x4b5   : > { %v1203_v36 = vsel %vm524_vm2, %v686_v22, %v1193_v34 }
 0x4b8   : > { %v1197_v35 = vpop.permute.xlu1 %1196 }
 0x4b9   : > { %v1205_v37 = vsel %vm1204_vm4, %v1203_v36, %v1197_v35 }
 0x4bc   : > { %v1201_v38 = vpop.permute.xlu0 %1200 }
 0x4bd   : > { %v1207_v39 = vsel %vm1206_vm5, %v1205_v37, %v1201_v38 }
 0x4be   : > { %1529 = vmatmul.mubr.msk.f32.vlgmr.msra.gmra.mrb[8].mxu0 %vm365_vm1, %v1207_v39 }
 0x591   : > { %v1288_v41 = vpop.f32.mrb[8].mxu0 }
 0x592   : > { %v1289_v42 = vadd.f32 %v1421_v40, %v1288_v41  ;;  %v1530_v43 = vpop.f32.mrb[9].mxu0 }
 0x594   : > { %v1292_v44 = vadd.f32 %v1289_v42, %v1712_v15  ;;  %v1423_v15 = vld [vmem:[%s1824_s7] ss:$0 sm:$0xff] }
 0x596   : > { %v1295_v45 = vsel %vm365_vm1, %v1292_v44, 0.0 }
 0x597   : > { %1296 = vadd.xlane.f32.xlu1 %v1295_v45 }
 0x624   : > { %v1297_v46 = vpop.xlane.xlu1 %1296 }
 0x625   : > { %v1299_v47 = vmul.f32 0.03125, %v1297_v46 }
 0x627   : > { %v1300_v48 = vsub.f32 %v1292_v44, %v1299_v47 }
 0x629   : > { %v1301_v49 = vmul.f32 %v1300_v48, %v1300_v48 }
 0x62b   : > { %v1302_v50 = vsel %vm365_vm1, %v1301_v49, 0.0 }
 0x62c   : > { %1303 = vadd.xlane.f32.xlu0 %v1302_v50 }
 0x6b9   : > { %v1304_v51 = vpop.xlane.xlu0 %1303 }
 0x6ba   : > { %v1305_v52 = vmul.f32 0.03125, %v1304_v51 }
 0x6bc   : > { %v1306_v53 = vadd.f32 1e-05, %v1305_v52 }
 0x6be   : > { %1586 = vrsqrt.f32 %v1306_v53 }
 0x6c8   : > { %v1587_v54 = vpop.eup %1586 }
 0x6c9   : > { %v1308_v55 = vmul.f32 %v1587_v54, %v1300_v48 }
 0x6cb   : > { %v1315_v57 = vmul.f32 %v1423_v15, %v1308_v55 }
 0x6cd   : > { %v1322_v58 = vadd.f32 %v1424_v56, %v1315_v57 }
 0x6cf   : > { %1323 = vst.msk [vmem:[%s358_s24] sm:$0xff] %vm365_vm1, %v1322_v58 }
 0x6d0 PF: > { %s19_s30 = sadd.s32 1, %s1594_s30  }
 0x6d1   : > { %p16_p4 = scmp.ge.s32.totalorder %s19_s30, 4  }
 0x6d3   :  { %18 = sbr.rel (!%p16_p4) target bundleno = 1 (0x1), region = 92 }

// kernel: _lambda_.15
= control target key start
LH: loop header
LB: loop body
LE: loop exit
PB: predicated region body
PF: predicated region fallthrough
CT: control target
= control target key end

     0   :  { %s1600_s27 = smov 0   ;;  %s1751_s0 = inlined_call_operand.vmem [shape: f32[2,8,32], index: 0, kind: input, shape index: {}, may-alias: {0,1}]   ;;  %s1752_s1 = inlined_call_operand.vmem [shape: f32[2,8,32], index: 1, kind: input, shape index: {}, may-alias: {0,1}]   ;;  %s1753_s2 = inlined_call_operand.vmem [shape: f32[32,32], index: 2, kind: input, shape index: {}]   ;;  %s1754_s3 = inlined_call_operand.vmem [shape: f32[32,64], index: 3, kind: input, shape index: {}]   ;;  %s1755_s4 = inlined_call_operand.vmem [shape: f32[32,32], index: 4, kind: input, shape index: {}]   ;;  %s1756_s5 = inlined_call_operand.vmem [shape: f32[1,32], index: 5, kind: input, shape index: {}]   ;;  %s1757_s6 = inlined_call_operand.vmem [shape: f32[1,32], index: 6, kind: input, shape index: {}]   ;;  %s1758_s7 = inlined_call_operand.vmem [shape: f32[1,32], index: 7, kind: input, shape index: {}]   ;;  %s1759_s8 = inlined_call_operand.vmem [shape: f32[2,8,32], index: 8, kind: output, shape index: {}]  }
   0x1 LB: > { %s1345_s28 = sadd.s32 4294967295, %s1540_s27   ;;  %p1349_p0 = scmp.ge.s32.totalorder %s1540_s27, 1  ;;  %s1540_s27 = sphi %s1600_s27, %s18_s27  }
   0x2   : > { %p270_p1 = scmp.lt.s32.totalorder %s1540_s27, 3 }
   0x4   : > { %p271_p2 = pnand %p1349_p0, %p270_p1 }
   0x5   : > { %v398_v0 = vld [vmem:[%s1754_s3] sm:$0xff] (!%p271_p2)  ;;  %v399_v1 = vld [vmem:[%s1754_s3 + $0x8] sm:$0xff] (!%p271_p2)  ;;  %v1542_v3 = vmov (!%p271_p2), 0.0|0.0   ;;  %v400_v6 = vld [vmem:[%s1754_s3 + $0x10] sm:$0xff] (!%p271_p2)  ;;  %p306_p3 = scmp.lt.s32.totalorder (!%p271_p2), %s1345_s28, 1  ;;  %vm1543_vm0 = vmmov (!%p271_p2), 0   ;;  %v475_v26 = vlaneseq (!%p271_p2) }
   0x6   : > { %274 = sbr.rel (%p271_p2) target bundleno = 1744 (0x6d0), region = 52  ;;  %v320_v2 = vld [vmem:[%s1753_s2] sm:$0xff] (!%p271_p2)  ;;  %1483 = vmatprep.subr.bf16.mxu1 (!%p271_p2), %v1542_v3  ;;  %v1484_v4 = vpack.c.bf16 (!%p271_p2), %v399_v1, %v398_v0  ;;  %1477 = vmatprep.subr.bf16.mxu0 (!%p271_p2), %v1542_v3  ;;  %v321_v5 = vld [vmem:[%s1753_s2 + $0x8] sm:$0xff] (!%p271_p2)  ;;  %v401_v7 = vld [vmem:[%s1754_s3 + $0x18] sm:$0xff] (!%p271_p2)  ;;  %v1544_v9 = vmov (!%p271_p2), 0.0   ;;  %vm324_vm1 = vcmask (!%p271_p2), 261120  }
   0x7   : > { %v1478_v8 = vpack.c.bf16 (!%p271_p2), %v321_v5, %v320_v2  ;;  %1423 = vmatprep.mubr.msk.f32.mxu1 (!%p271_p2), %vm1543_vm0, %v1544_v9  ;;  %v322_v10 = vld [vmem:[%s1753_s2 + $0x10] sm:$0xff] (!%p271_p2)  ;;  %v323_v11 = vld [vmem:[%s1753_s2 + $0x18] sm:$0xff] (!%p271_p2)  ;;  %1412 = vmatprep.mubr.msk.f32.mxu0 (!%p271_p2), %vm1543_vm0, %v1544_v9  ;;  %v1487_v12 = vpack.c.bf16 (!%p271_p2), %v401_v7, %v400_v6  ;;  %vm480_vm2 = vcmask (!%p271_p2), 64512   ;;  %s1546_s10 = smov (!%p271_p2), 120   ;;  %s1547_s11 = smov (!%p271_p2), 104   ;;  %v476_v27 = vshrl.u32 (!%p271_p2), %v475_v26, 7 }
   0x8   : > { %1485 = vmatpush3.bf16.msra.mxu1 (!%p271_p2), %v1484_v4  ;;  %v1481_v13 = vpack.c.bf16 (!%p271_p2), %v323_v11, %v322_v10  ;;  %v478_v28 = vand.u32 (!%p271_p2), 127, %v475_v26  ;;  %s1548_s12 = smov (!%p271_p2), 96   ;;  %s1549_s13 = smov (!%p271_p2), 80   ;;  %v1164_v26 = vld [vmem:[%s1755_s4] sm:$0xff] (!%p271_p2)  ;;  %vm1160_vm4 = vcmask (!%p271_p2), 130048   ;;  %vm1162_vm5 = vcmask (!%p271_p2), 195584  }
   0x9   : > { %1479 = vmatpush3.bf16.msra.mxu0 (!%p271_p2), %v1478_v8  ;;  %1486 = vmatprep.subr.bf16.mxu1 (!%p271_p2), %v1542_v3  ;;  %s1550_s14 = smov (!%p271_p2), 72   ;;  %s1551_s15 = smov (!%p271_p2), 88  }
   0xa   : > { %1480 = vmatprep.subr.bf16.mxu0 (!%p271_p2), %v1542_v3  ;;  %vm479_vm3 = vcmp.ge.s32.totalorder (!%p271_p2), %v476_v27, %v478_v28  ;;  %v1165_v27 = vld [vmem:[%s1755_s4 + $0x8] sm:$0xff] (!%p271_p2)  ;;  %s1552_s25 = smov (!%p271_p2), 8   ;;  %s1554_s29 = smov (!%p271_p2), 24  }
   0xb   : > { %v1490_v28 = vpack.c.bf16 (!%p271_p2), %v1165_v27, %v1164_v26 }
   0xc   : > { %1488 = vmatpush3.bf16.msra.mxu1 (!%p271_p2), %v1487_v12 }
   0xd   : > { %s1761_s28 = smov (!%p306_p3, %s1345_s28), 1  ;;  %1482 = vmatpush3.bf16.msra.mxu0 %v1481_v13  ;;  %1426 = vmatprep.subr.mxu1 %v1544_v9 }
   0xe   : > { %s1640_s23 = sshll.u32 %s1761_s28, 3  ;;  %1436 = vmatprep.subr.mxu0 %v1544_v9  ;;  %s1545_s28 = smov 112  }
   0xf   : > { %s309_s26 = scalar_lea.vmem %s1751_s0, %s1640_s23  ;;  %s313_s9 = scalar_lea.vmem %s1752_s1, %s1640_s23 }
  0x10   : > { %v319_v14 = vld [vmem:[%s309_s26] sm:$0xff]  ;;  %s1553_s26 = smov 16  }
  0x11   : > { %v1650_v15 = vld [vmem:[%s313_s9] sm:$0xff]  ;;  %1424 = vmatmul.mubr.msk.f32.vlgmr.msra.gmra.mrb[0].mxu1 %vm324_vm1, %v319_v14 }
  0x12   : > { %1413 = vmatmul.mubr.msk.f32.vlgmr.msra.gmra.mrb[0].mxu0 %vm324_vm1, %v1650_v15  ;;  %1428 = vmatprep.mubr.msk.f32.mxu1 %vm1543_vm0, %v1544_v9 }
  0x13   : > { %1438 = vmatprep.mubr.msk.f32.mxu0 %vm1543_vm0, %v1544_v9 }
  0xe4   : > { %v1661_v16 = vpop.f32.mrb[0].mxu1 }
  0xe5   : > { %815 = vrot.lane.b32.xlu1 %v1661_v16, %s1545_s28  ;;  %648 = vrot.lane.b32.xlu0 %v1661_v16, %s1546_s10  ;;  %v1425_v17 = vpop.f32.mrb[1].mxu1  ;;  %v394_v18 = vpop.f32.mrb[0].mxu0 }
  0xe6   : > { %1427 = vmatpush3.xpose.msk.msra.mxu1 %vm480_vm2, %v1661_v16  ;;  %v1414_v19 = vpop.f32.mrb[1].mxu0 }
  0xe7   : > { %1431 = vmatprep.subr.mxu1 %v1544_v9 }
  0xe9   : > { %1429 = vmatmul.mubr.msk.f32.vlgmr.msra.gmra.mrb[2].mxu1 %vm480_vm2, %v394_v18  ;;  %813 = vrot.lane.b32.xlu1 %v394_v18, %s1545_s28 }
  0xea   : > { %646 = vrot.lane.b32.xlu0 %v394_v18, %s1546_s10  ;;  %1433 = vmatprep.mubr.msk.f32.mxu1 %vm1543_vm0, %v1544_v9 }
  0xed   : > { %980 = vrot.lane.b32.xlu1 %v394_v18, %s1547_s11 }
  0xee   : > { %982 = vrot.lane.b32.xlu0 %v1661_v16, %s1547_s11 }
 0x157   : > { %v649_v20 = vpop.permute.xlu0 %648  ;;  %v816_v21 = vpop.permute.xlu1 %815 }
 0x158   : > { %1437 = vmatpush3.xpose.msk.msra.mxu0 %vm480_vm2, %v649_v20 }
 0x159   : > { %1446 = vmatprep.subr.mxu0 %v1544_v9 }
 0x15b   : > { %v814_v23 = vpop.permute.xlu1 %813 }
 0x15c   : > { %v647_v22 = vpop.permute.xlu0 %646 }
 0x15d   : > { %1439 = vmatmul.mubr.msk.f32.vlgmr.msra.gmra.mrb[2].mxu0 %vm480_vm2, %v647_v22 }
 0x15e   : > { %1447 = vmatpush3.xpose.msk.msra.mxu0 %vm480_vm2, %v816_v21  ;;  %1448 = vmatprep.mubr.msk.f32.mxu0 %vm1543_vm0, %v1544_v9 }
 0x15f   : > { %1456 = vmatprep.subr.mxu0 %v1544_v9  ;;  %v981_v25 = vpop.permute.xlu1 %980 }
 0x160   : > { %v983_v24 = vpop.permute.xlu0 %982 }
 0x161   : > { %1449 = vmatmul.mubr.msk.f32.vlgmr.msra.gmra.mrb[4].mxu0 %vm480_vm2, %v814_v23 }
 0x162   : > { %1457 = vmatpush3.xpose.msk.msra.mxu0 %vm480_vm2, %v983_v24  ;;  %1458 = vmatprep.mubr.msk.f32.mxu0 %vm1543_vm0, %v1544_v9 }
 0x163   : > { %1489 = vmatprep.subr.bf16.mxu0 %v1542_v3 }
 0x165   : > { %1459 = vmatmul.mubr.msk.f32.vlgmr.msra.gmra.mrb[6].mxu0 %vm480_vm2, %v981_v25 }
 0x166   : > { %1474 = vmatprep.mubr.msk.f32.mxu0 %vm1543_vm0, %v1544_v9  ;;  %1491 = vmatpush3.bf16.msra.mxu0 %v1490_v28 }
 0x167   : > { %1492 = vmatprep.subr.bf16.mxu0 %v1542_v3 }
 0x1bc   : > { %v553_v29 = vpop.f32.mrb[2].mxu1 }
 0x1bd   : > { %v557_v30 = vsel %vm479_vm3, %v553_v29, -1e+20  ;;  %v1430_v31 = vpop.f32.mrb[3].mxu1  ;;  %v1167_v29 = vld [vmem:[%s1755_s4 + $0x18] sm:$0xff] }
 0x1be   : > { %v558_v32 = vmul.f32 0.17677669, %v557_v30 }
 0x1c0   : > { %v559_v33 = vsel %vm480_vm2, %v558_v32, -inf }
 0x1c1   : > { %560 = vmax.xlane.f32.xlu0 %v559_v33 }
 0x230   : > { %v720_v34 = vpop.f32.mrb[2].mxu0 }
 0x231   : > { %v724_v35 = vsel %vm479_vm3, %v720_v34, -1e+20  ;;  %v1440_v36 = vpop.f32.mrb[3].mxu0 }
 0x232   : > { %v725_v37 = vmul.f32 0.17677669, %v724_v35 }
 0x234   : > { %v887_v38 = vpop.f32.mrb[4].mxu0  ;;  %v726_v39 = vsel %vm480_vm2, %v725_v37, -inf }
 0x235   : > { %v891_v40 = vsel %vm479_vm3, %v887_v38, -1e+20  ;;  %727 = vmax.xlane.f32.xlu1 %v726_v39  ;;  %v1450_v41 = vpop.f32.mrb[5].mxu0 }
 0x236   : > { %v892_v42 = vmul.f32 0.17677669, %v891_v40 }
 0x238   : > { %v1054_v43 = vpop.f32.mrb[6].mxu0  ;;  %v893_v44 = vsel %vm480_vm2, %v892_v42, -inf }
 0x239   : > { %v1058_v45 = vsel %vm479_vm3, %v1054_v43, -1e+20  ;;  %v1460_v46 = vpop.f32.mrb[7].mxu0  ;;  %894 = vmax.xlane.f32.xlu0 %v893_v44 }
 0x23a   : > { %v1059_v47 = vmul.f32 0.17677669, %v1058_v45 }
 0x23c   : > { %v1060_v48 = vsel %vm480_vm2, %v1059_v47, -inf }
 0x23d   : > { %1061 = vmax.xlane.f32.xlu0 %v1060_v48 }
 0x246   : > { %570 = vrot.lane.b32.xlu1 %v1661_v16, %s1548_s12 }
 0x24e   : > { %v561_v49 = vpop.xlane.xlu0 %560 }
 0x24f   : > { %v562_v50 = vsub.f32 %v558_v32, %v561_v49 }
 0x251   : > { %v563_v51 = vmul.f32 1.442695, %v562_v50 }
 0x253   : > { %1516 = vpow2.f32 %v563_v51 }
 0x25d   : > { %v1517_v52 = vpop.eup %1516 }
 0x25e   : > { %v565_v53 = vsel %vm480_vm2, %v1517_v52, 0.0 }
 0x26a   : > { %566 = vadd.xlane.f32.xlu1 %v565_v53 }
 0x2c2   : > { %v728_v54 = vpop.xlane.xlu1 %727 }
 0x2c3   : > { %v729_v55 = vsub.f32 %v725_v37, %v728_v54 }
 0x2c5   : > { %v730_v56 = vmul.f32 1.442695, %v729_v55 }
 0x2c6   : > { %v571_v57 = vpop.permute.xlu1 %570  ;;  %v895_v58 = vpop.xlane.xlu0 %894 }
 0x2c7   : > { %1518 = vpow2.f32 %v730_v56  ;;  %v896_v59 = vsub.f32 %v892_v42, %v895_v58  ;;  %1432 = vmatpush3.msra.mxu1 %v571_v57  ;;  %v1367_v42 = vld [vmem:[%s1756_s5] ss:$0 sm:$0xff] }
 0x2c8   : > { %1441 = vmatprep.subr.mxu1 %v1544_v9  ;;  %v1370_v58 = vld [vmem:[%s1758_s7] ss:$0 sm:$0xff] }
 0x2c9   : > { %v897_v60 = vmul.f32 1.442695, %v896_v59 }
 0x2ca   : > { %v1062_v61 = vpop.xlane.xlu0 %1061 }
 0x2cb   : > { %1520 = vpow2.f32 %v897_v60  ;;  %v1063_v62 = vsub.f32 %v1059_v47, %v1062_v61 }
 0x2cd   : > { %v1064_v63 = vmul.f32 1.442695, %v1063_v62 }
 0x2cf   : > { %1522 = vpow2.f32 %v1064_v63 }
 0x2d1   : > { %v1519_v0 = vpop.eup %1518 }
 0x2d2   : > { %v732_v1 = vsel %vm480_vm2, %v1519_v0, 0.0 }
 0x2d3   : > { %733 = vadd.xlane.f32.xlu0 %v732_v1 }
 0x2d5   : > { %v1521_v2 = vpop.eup %1520 }
 0x2d6   : > { %v899_v4 = vsel %vm480_vm2, %v1521_v2, 0.0 }
 0x2d7   : > { %900 = vadd.xlane.f32.xlu1 %v899_v4 }
 0x2d9   : > { %v1523_v5 = vpop.eup %1522 }
 0x2da   : > { %v1066_v6 = vsel %vm480_vm2, %v1523_v5, 0.0 }
 0x2db   : > { %1067 = vadd.xlane.f32.xlu0 %v1066_v6 }
 0x2e8   : > { %904 = vrot.lane.b32.xlu1 %v1661_v16, %s1549_s13 }
 0x2ec   : > { %1071 = vrot.lane.b32.xlu1 %v1661_v16, %s1550_s14 }
 0x2f1   : > { %737 = vrot.lane.b32.xlu0 %v1661_v16, %s1551_s15  ;;  %s317_s15 = scalar_lea.vmem %s1759_s8, %s1640_s23 }
 0x2f7   : > { %v567_v7 = vpop.xlane.xlu1 %566 }
 0x2f8   : > { %1524 = vrcp.f32 %v567_v7 }
 0x302   : > { %v1525_v8 = vpop.eup %1524 }
 0x303   : > { %v569_v10 = vmul.f32 %v1525_v8, %v1517_v52 }
 0x305   : > { %1434 = vmatmul.mubr.msk.f32.vlgmr.msra.gmra.mrb[4].mxu1 %vm480_vm2, %v569_v10 }
 0x306   : > { %1443 = vmatprep.mubr.msk.f32.mxu1 %vm1543_vm0, %v1544_v9 }
 0x360   : > { %v734_v11 = vpop.xlane.xlu0 %733 }
 0x361   : > { %1526 = vrcp.f32 %v734_v11 }
 0x364   : > { %v901_v12 = vpop.xlane.xlu1 %900 }
 0x365   : > { %1528 = vrcp.f32 %v901_v12 }
 0x368   : > { %v1068_v13 = vpop.xlane.xlu0 %1067  ;;  %v905_v18 = vpop.permute.xlu1 %904 }
 0x369   : > { %1530 = vrcp.f32 %v1068_v13 }
 0x36b   : > { %v1527_v14 = vpop.eup %1526 }
 0x36c   : > { %v736_v17 = vmul.f32 %v1527_v14, %v1519_v0  ;;  %v738_v19 = vpop.permute.xlu0 %737  ;;  %v1072_v21 = vpop.permute.xlu1 %1071 }
 0x36d   : > { %1442 = vmatpush3.msra.mxu1 %v738_v19 }
 0x36e   : > { %1444 = vmatmul.mubr.msk.f32.vlgmr.msra.gmra.mrb[6].mxu1 %vm480_vm2, %v736_v17  ;;  %1451 = vmatprep.subr.mxu1 %v1544_v9 }
 0x36f   : > { %v1529_v16 = vpop.eup %1528  ;;  %1452 = vmatpush3.msra.mxu1 %v905_v18  ;;  %1453 = vmatprep.mubr.msk.f32.mxu1 %vm1543_vm0, %v1544_v9 }
 0x370   : > { %v903_v20 = vmul.f32 %v1529_v16, %v1521_v2  ;;  %1461 = vmatprep.subr.mxu1 %v1544_v9 }
 0x372   : > { %1454 = vmatmul.mubr.msk.f32.vlgmr.msra.gmra.mrb[8].mxu1 %vm480_vm2, %v903_v20 }
 0x373   : > { %v1531_v22 = vpop.eup %1530  ;;  %1462 = vmatpush3.msra.mxu1 %v1072_v21  ;;  %1463 = vmatprep.mubr.msk.f32.mxu1 %vm1543_vm0, %v1544_v9  ;;  %v1166_v9 = vld [vmem:[%s1755_s4 + $0x10] sm:$0xff] }
 0x374   : > { %v1070_v23 = vmul.f32 %v1531_v22, %v1523_v5  ;;  %v1493_v30 = vpack.c.bf16 %v1167_v29, %v1166_v9 }
 0x376   : > { %1464 = vmatmul.mubr.msk.f32.vlgmr.msra.gmra.mrb[10].mxu1 %vm480_vm2, %v1070_v23  ;;  %1494 = vmatpush3.bf16.msra.mxu0 %v1493_v30 }
 0x3d8   : > { %v642_v24 = vpop.f32.mrb[4].mxu1 }
 0x3d9   : > { %v1435_v25 = vpop.f32.mrb[5].mxu1 }
 0x441   : > { %v809_v31 = vpop.f32.mrb[6].mxu1 }
 0x442   : > { %1148 = vrot.lane.b32.xlu0 %v809_v31, %s1552_s25  ;;  %v1445_v32 = vpop.f32.mrb[7].mxu1 }
 0x445   : > { %v976_v33 = vpop.f32.mrb[8].mxu1 }
 0x446   : > { %1152 = vrot.lane.b32.xlu1 %v976_v33, %s1553_s26  ;;  %v1455_v34 = vpop.f32.mrb[9].mxu1 }
 0x449   : > { %v1143_v35 = vpop.f32.mrb[10].mxu1 }
 0x44a   : > { %1156 = vrot.lane.b32.xlu0 %v1143_v35, %s1554_s29  ;;  %v1465_v3 = vpop.f32.mrb[11].mxu1 }
 0x4b4   : > { %v1149_v36 = vpop.permute.xlu0 %1148 }
 0x4b5   : > { %v1159_v38 = vsel %vm480_vm2, %v642_v24, %v1149_v36 }
 0x4b8   : > { %v1153_v37 = vpop.permute.xlu1 %1152 }
 0x4b9   : > { %v1161_v39 = vsel %vm1160_vm4, %v1159_v38, %v1153_v37 }
 0x4bc   : > { %v1157_v40 = vpop.permute.xlu0 %1156 }
 0x4bd   : > { %v1163_v41 = vsel %vm1162_vm5, %v1161_v39, %v1157_v40 }
 0x4be   : > { %1475 = vmatmul.mubr.msk.f32.vlgmr.msra.gmra.mrb[8].mxu0 %vm324_vm1, %v1163_v41 }
 0x591   : > { %v1244_v43 = vpop.f32.mrb[8].mxu0 }
 0x592   : > { %v1245_v44 = vadd.f32 %v1367_v42, %v1244_v43  ;;  %v1476_v45 = vpop.f32.mrb[9].mxu0 }
 0x594   : > { %v1248_v46 = vadd.f32 %v1245_v44, %v1650_v15  ;;  %v1369_v15 = vld [vmem:[%s1757_s6] ss:$0 sm:$0xff] }
 0x596   : > { %v1251_v47 = vsel %vm324_vm1, %v1248_v46, 0.0 }
 0x597   : > { %1252 = vadd.xlane.f32.xlu1 %v1251_v47 }
 0x624   : > { %v1253_v48 = vpop.xlane.xlu1 %1252 }
 0x625   : > { %v1255_v49 = vmul.f32 0.03125, %v1253_v48 }
 0x627   : > { %v1256_v50 = vsub.f32 %v1248_v46, %v1255_v49 }
 0x629   : > { %v1257_v51 = vmul.f32 %v1256_v50, %v1256_v50 }
 0x62b   : > { %v1258_v52 = vsel %vm324_vm1, %v1257_v51, 0.0 }
 0x62c   : > { %1259 = vadd.xlane.f32.xlu0 %v1258_v52 }
 0x6b9   : > { %v1260_v53 = vpop.xlane.xlu0 %1259 }
 0x6ba   : > { %v1261_v54 = vmul.f32 0.03125, %v1260_v53 }
 0x6bc   : > { %v1262_v55 = vadd.f32 1e-05, %v1261_v54 }
 0x6be   : > { %1532 = vrsqrt.f32 %v1262_v55 }
 0x6c8   : > { %v1533_v56 = vpop.eup %1532 }
 0x6c9   : > { %v1264_v57 = vmul.f32 %v1533_v56, %v1256_v50 }
 0x6cb   : > { %v1271_v59 = vmul.f32 %v1369_v15, %v1264_v57 }
 0x6cd   : > { %v1278_v60 = vadd.f32 %v1370_v58, %v1271_v59 }
 0x6cf   : > { %1279 = vst.msk [vmem:[%s317_s15] sm:$0xff] %vm324_vm1, %v1278_v60 }
 0x6d0 PF: > { %s18_s27 = sadd.s32 1, %s1540_s27  }
 0x6d1   : > { %p15_p4 = scmp.ge.s32.totalorder %s18_s27, 4  }
 0x6d3   :  { %17 = sbr.rel (!%p15_p4) target bundleno = 1 (0x1), region = 85 }

</bundles_post_ra>
